<compile_context>
chip_gen: v7x
topology: tpu7x:2x2x1
jax: 0.10.0
libtpu: 0.0.40
codegen_flags: <defaults>
</compile_context>

<pallas_src>
import math
import numpy as np
import jax
import jax.numpy as jnp
from jax import lax
from jax.experimental import pallas as pl
from jax.experimental.pallas import tpu as pltpu

# ---------------- module-consistent config ----------------
B = 2               # batch
S = 8               # sequence length (<= 20, positional-encoding table size)
BS = B * S          # 16 rows with batch folded
INP_FEATURES = 16   # inp_features
D = 32              # d_model
H = 4               # num_heads
HD = D // H         # head_dim = 8
HIDDEN = 64         # hidden_mlp_dim
OUT_FEATURES = 16   # out_features
OUT_SEQ = 4         # output_projection consumes x[:, :4, :]
NUM_LAYERS = 2
EPS_LN = 1e-9

# ---------------- packed-parameter slab geometry (all row offsets % 8 == 0) ---
PW = 96                                     # slab width (>= 3*D)
OFF_WIN = 0                                 # w_in * sqrt(D)        (16, 32)
OFF_POSB = OFF_WIN + INP_FEATURES           # pos + b_in*sqrt(D)    (16, 32)
OFF_SEL = OFF_POSB + BS                     # scramble selection    (16, 64)
OFF_CMASK = OFF_SEL + BS                    # scramble column mask  (64, 32)
OFF_ABIAS = OFF_CMASK + H * BS              # batch-block attn bias (16, 16)
OFF_WOUT = OFF_ABIAS + BS                   # w_out                 (32, 16)
OFF_LAYER = OFF_WOUT + D                    # per-layer weights start
LAYER_ROWS = 3 * D + HIDDEN                 # wqkv(32)+wo(32)+w1(32)+w2(64)=160
WSLAB_ROWS = OFF_LAYER + NUM_LAYERS * LAYER_ROWS     # 480

VROWS_PER_LAYER = 8                         # bqkv, bo, b1, b2, g1, be1, g2, be2
VOFF_BOUT = NUM_LAYERS * VROWS_PER_LAYER    # 16
VSLAB_ROWS = VOFF_BOUT + 8                  # 24 (keep 8-row alignment)

ATTN_W = NUM_LAYERS * H * BS                # 128 -> fully lane-dense attn store


# ---------------- positional encoding (same math as the torch code) ----------
def positional_encoding_np(d_model, position=20):
    pos = np.arange(position)[:, np.newaxis].astype(np.float64)
    i = np.arange(d_model)[np.newaxis, :].astype(np.float64)
    angle_rates = 1.0 / np.power(10000.0, 2 * (i // 2) / np.float32(d_model))
    angle_rads = pos * angle_rates
    angle_rads[:, 0::2] = np.sin(angle_rads[:, 0::2])
    angle_rads[:, 1::2] = np.cos(angle_rads[:, 1::2])
    return angle_rads[np.newaxis, ...].astype(np.float32)   # (1, position, D)


# ---------------- shared layernorm helper ----------------
def _layernorm(x, gamma, beta, eps=EPS_LN):
    mean = jnp.mean(x, axis=-1, keepdims=True)
    var = jnp.mean((x - mean) ** 2, axis=-1, keepdims=True)
    return gamma * ((x - mean) * lax.rsqrt(var + eps)) + beta


# ---------------- host-side scramble / mask constants ----------------
def _build_scramble_constants():
    """Constants reproducing torch's raw (B,H,S,hd)->(B,S,H*hd) reshape.

    vstack row layout:  rr = h*BS + (b*S + s)  ->  values[b, h, s, :]
    scrambled[R=b*S+s', c=j*HD+e] = values[b, h', s'', e]   (torch flat reshape)
    with rows_per_head = S*HD // D, blocks = D // HD.
    """
    rows_per_head = (S * HD) // D    # 2
    blocks = D // HD                 # 4
    sel = np.zeros((BS, H * BS), np.float32)
    rr_block = -np.ones(H * BS, np.int64)
    for R in range(BS):
        b, sp = divmod(R, S)
        hprime = sp // rows_per_head
        for j in range(blocks):
            s2 = (sp % rows_per_head) * blocks + j
            rr = hprime * BS + b * S + s2
            sel[R, rr] = 1.0
            assert rr_block[rr] in (-1, j)
            rr_block[rr] = j
    colmask = np.zeros((H * BS, D), np.float32)
    for rr in range(H * BS):
        j = int(rr_block[rr])
        assert j >= 0
        colmask[rr, j * HD:(j + 1) * HD] = 1.0
    # additive bias masking cross-batch attention pairs (batch is row-folded)
    attn_bias = np.full((BS, BS), -1e30, np.float32)
    for b in range(B):
        attn_bias[b * S:(b + 1) * S, b * S:(b + 1) * S] = 0.0
    return sel, colmask, attn_bias


# ---------------- the fused Pallas kernel ----------------
def _encoder_kernel(x_ref, w_ref, v_ref, out_ref, attn_ref):
    # grid-invariant constants / small weights (read once)
    w_in = w_ref[OFF_WIN:OFF_WIN + INP_FEATURES, 0:D]
    posb = w_ref[OFF_POSB:OFF_POSB + BS, 0:D]
    sel = w_ref[OFF_SEL:OFF_SEL + BS, 0:H * BS]
    colmask = w_ref[OFF_CMASK:OFF_CMASK + H * BS, 0:D]
    attn_bias = w_ref[OFF_ABIAS:OFF_ABIAS + BS, 0:BS]
    w_out = w_ref[OFF_WOUT:OFF_WOUT + D, 0:OUT_FEATURES]
    b_out = v_ref[VOFF_BOUT:VOFF_BOUT + 1, 0:OUT_FEATURES]

    # input projection; sqrt(D), b_in and pos-encoding are folded host-side
    x = x_ref[...]                                                   # (BS, INP)
    y = jnp.dot(x, w_in, preferred_element_type=jnp.float32) + posb  # (BS, D)

    attn_pieces = []
    for l in range(NUM_LAYERS):                                      # static unroll
        base = OFF_LAYER + l * LAYER_ROWS
        wqkv = w_ref[base:base + D, 0:3 * D]                         # (D, 3D)
        wo = w_ref[base + D:base + 2 * D, 0:D]                       # (D, D)
        w1 = w_ref[base + 2 * D:base + 3 * D, 0:HIDDEN]              # (D, HIDDEN)
        w2 = w_ref[base + 3 * D:base + 3 * D + HIDDEN, 0:D]          # (HIDDEN, D)
        vb = l * VROWS_PER_LAYER
        bqkv = v_ref[vb + 0:vb + 1, 0:3 * D]
        bo = v_ref[vb + 1:vb + 2, 0:D]
        b1 = v_ref[vb + 2:vb + 3, 0:HIDDEN]
        b2 = v_ref[vb + 3:vb + 4, 0:D]
        g1 = v_ref[vb + 4:vb + 5, 0:D]
        be1 = v_ref[vb + 5:vb + 6, 0:D]
        g2 = v_ref[vb + 6:vb + 7, 0:D]
        be2 = v_ref[vb + 7:vb + 8, 0:D]

        # ---- ONE packed QKV projection per layer (q columns pre-scaled) ----
        qkv = jnp.dot(y, wqkv, preferred_element_type=jnp.float32) + bqkv   # (BS, 3D)

        vals = []
        for h in range(H):                                           # static unroll
            qh = qkv[:, h * HD:(h + 1) * HD]                         # (BS, HD)
            kh = qkv[:, D + h * HD:D + (h + 1) * HD]
            vh = qkv[:, 2 * D + h * HD:2 * D + (h + 1) * HD]
            s = lax.dot_general(qh, kh, (((1,), (1,)), ((), ())),
                                preferred_element_type=jnp.float32)  # (BS, BS)
            s = s + attn_bias                        # kill cross-batch pairs
            s = s - jnp.max(s, axis=-1, keepdims=True)
            e = jnp.exp(s)
            a = e / jnp.sum(e, axis=-1, keepdims=True)               # exact softmax
            attn_pieces.append(a)
            vals.append(jnp.dot(a, vh,
                                preferred_element_type=jnp.float32))  # (BS, HD)

        # torch's raw reshape (B,H,S,hd)->(B,S,H*hd) without transpose, with the
        # batch folded into rows: one masked lane-tile + one selection matmul.
        vstack = jnp.concatenate(vals, axis=0)                        # (H*BS, HD)
        tiled = jnp.concatenate([vstack] * (D // HD), axis=1) * colmask   # (H*BS, D)
        scrambled = jnp.dot(sel, tiled,
                            preferred_element_type=jnp.float32)       # (BS, D)

        attn_out = jnp.dot(scrambled, wo,
                           preferred_element_type=jnp.float32) + bo
        # dropout1 / dropout2 == identity (inference)
        y1 = _layernorm(attn_out + y, g1, be1)
        hmid = jnp.maximum(
            jnp.dot(y1, w1, preferred_element_type=jnp.float32) + b1, 0.0)
        ff = jnp.dot(hmid, w2, preferred_element_type=jnp.float32) + b2
        y = _layernorm(ff + y1, g2, be2)

    # output projection over all folded rows; wrapper keeps the first OUT_SEQ
    # positions of each batch (extra rows are negligible compute).
    out_ref[...] = jnp.dot(y, w_out, preferred_element_type=jnp.float32) + b_out
    # single lane-dense (16, 128) attention-weights store
    attn_ref[...] = jnp.concatenate(attn_pieces, axis=1)


# ---------------- host-side parameter packing ----------------
def pack_params(params, pos_enc):
    sqrt_d = math.sqrt(D)
    qscale = 1.0 / math.sqrt(HD)
    sel, colmask, attn_bias = _build_scramble_constants()

    wslab = np.zeros((WSLAB_ROWS, PW), np.float32)
    vslab = np.zeros((VSLAB_ROWS, PW), np.float32)

    w_in = np.asarray(params["w_in"], np.float32) * sqrt_d
    posb = (np.tile(np.asarray(pos_enc, np.float32)[0, :S, :], (B, 1))
            + np.asarray(params["b_in"], np.float32)[0] * sqrt_d)    # (BS, D)
    wslab[OFF_WIN:OFF_WIN + INP_FEATURES, 0:D] = w_in
    wslab[OFF_POSB:OFF_POSB + BS, 0:D] = posb
    wslab[OFF_SEL:OFF_SEL + BS, 0:H * BS] = sel
    wslab[OFF_CMASK:OFF_CMASK + H * BS, 0:D] = colmask
    wslab[OFF_ABIAS:OFF_ABIAS + BS, 0:BS] = attn_bias
    wslab[OFF_WOUT:OFF_WOUT + D, 0:OUT_FEATURES] = np.asarray(params["w_out"],
                                                              np.float32)

    # column permutation of the torch qkv layer: [q_h0..q_h3 | k_h0.. | v_h0..]
    perm = ([h * 3 * HD + i for h in range(H) for i in range(HD)] +
            [h * 3 * HD + HD + i for h in range(H) for i in range(HD)] +
            [h * 3 * HD + 2 * HD + i for h in range(H) for i in range(HD)])

    for l, lp in enumerate(params["layers"]):
        base = OFF_LAYER + l * LAYER_ROWS
        wqkv = np.asarray(lp["wqkv"], np.float32)[:, perm]           # copy
        bqkv = np.asarray(lp["bqkv"], np.float32)[0, perm]           # copy
        wqkv[:, :D] *= qscale                                        # fold 1/sqrt(hd)
        bqkv[:D] *= qscale
        wslab[base:base + D, 0:3 * D] = wqkv
        wslab[base + D:base + 2 * D, 0:D] = np.asarray(lp["wo"], np.float32)
        wslab[base + 2 * D:base + 3 * D, 0:HIDDEN] = np.asarray(lp["w1"], np.float32)
        wslab[base + 3 * D:base + 3 * D + HIDDEN, 0:D] = np.asarray(lp["w2"],
                                                                    np.float32)
        vb = l * VROWS_PER_LAYER
        vslab[vb + 0, 0:3 * D] = bqkv
        vslab[vb + 1, 0:D] = np.asarray(lp["bo"], np.float32)[0]
        vslab[vb + 2, 0:HIDDEN] = np.asarray(lp["bf1"], np.float32)[0]
        vslab[vb + 3, 0:D] = np.asarray(lp["bf2"], np.float32)[0]
        vslab[vb + 4, 0:D] = np.asarray(lp["g1"], np.float32)[0]
        vslab[vb + 5, 0:D] = np.asarray(lp["be1"], np.float32)[0]
        vslab[vb + 6, 0:D] = np.asarray(lp["g2"], np.float32)[0]
        vslab[vb + 7, 0:D] = np.asarray(lp["be2"], np.float32)[0]

    vslab[VOFF_BOUT, 0:OUT_FEATURES] = np.asarray(params["b_out"], np.float32)[0]
    return jnp.asarray(wslab), jnp.asarray(vslab)


# ---------------- wrapper: one fused pallas_call, single grid step ----------
@jax.jit
def encoder_forward(x, wslab, vslab):
    x2 = x.reshape(BS, INP_FEATURES)
    out_full, attn_slab = pl.pallas_call(
        _encoder_kernel,
        out_shape=(jax.ShapeDtypeStruct((BS, OUT_FEATURES), jnp.float32),
                   jax.ShapeDtypeStruct((BS, ATTN_W), jnp.float32)),
        grid=(1,),
        in_specs=[
            pl.BlockSpec((BS, INP_FEATURES), lambda i: (0, 0)),      # x (batch folded)
            pl.BlockSpec((WSLAB_ROWS, PW), lambda i: (0, 0)),        # weight slab
            pl.BlockSpec((VSLAB_ROWS, PW), lambda i: (0, 0)),        # bias/LN slab
        ],
        out_specs=(pl.BlockSpec((BS, OUT_FEATURES), lambda i: (0, 0)),
                   pl.BlockSpec((BS, ATTN_W), lambda i: (0, 0))),    # lane-dense
        compiler_params=pltpu.CompilerParams(
            dimension_semantics=("arbitrary",)),
    )(x2, wslab, vslab)

    out = out_full.reshape(B, S, OUT_FEATURES)[:, :OUT_SEQ, :]
    # un-scramble the lane-dense attention slab back to (L, B, H, S, S)
    a = attn_slab.reshape(B, S, NUM_LAYERS, H, B, S)   # [b, q, l, h, b', k]
    idx = jnp.arange(B)
    a = a[idx, :, :, :, idx, :]                        # diag over batch -> (B,S,L,H,S)
    a = jnp.transpose(a, (2, 0, 3, 1, 4))              # (L, B, H, S, S)
    return out, a


# ---------------- pure-JAX reference (torch semantics, incl. raw reshape) ----
def reference_forward(x, params, pos_enc):
    y = x @ params["w_in"] + params["b_in"][0]
    y = y * math.sqrt(D) + pos_enc[:, :S, :]
    attn_all = {}
    for i, lp in enumerate(params["layers"]):
        qkv = y @ lp["wqkv"] + lp["bqkv"][0]                         # (B,S,3D)
        qkv = qkv.reshape(B, S, H, 3 * HD).transpose(0, 2, 1, 3)     # (B,H,S,3hd)
        q, k, v = qkv[..., :HD], qkv[..., HD:2 * HD], qkv[..., 2 * HD:]
        s = jnp.einsum("bhqd,bhkd->bhqk", q, k) / math.sqrt(HD)
        a = jax.nn.softmax(s, axis=-1)
        vals = jnp.einsum("bhqk,bhkd->bhqd", a, v)                   # (B,H,S,hd)
        vals = vals.reshape(B, S, H * HD)                            # raw reshape (torch)
        attn_out = vals @ lp["wo"] + lp["bo"][0]
        y1 = _layernorm(attn_out + y, lp["g1"][0], lp["be1"][0])
        hh = jax.nn.relu(y1 @ lp["w1"] + lp["bf1"][0])
        ff = hh @ lp["w2"] + lp["bf2"][0]
        y = _layernorm(ff + y1, lp["g2"][0], lp["be2"][0])
        attn_all[i] = a
    out = y[:, :OUT_SEQ, :] @ params["w_out"] + params["b_out"][0]
    return out, attn_all


# ---------------- deterministic parameter init ----------------
def init_params(key):
    def linear(k, fan_in, fan_out):
        kw, kb = jax.random.split(k)
        bound = 1.0 / math.sqrt(fan_in)
        w = jax.random.uniform(kw, (fan_in, fan_out), jnp.float32, -bound, bound)
        b = jax.random.uniform(kb, (1, fan_out), jnp.float32, -bound, bound)
        return w, b

    keys = jax.random.split(key, 2 + NUM_LAYERS)
    w_in, b_in = linear(keys[0], INP_FEATURES, D)
    w_out, b_out = linear(keys[1], D, OUT_FEATURES)
    layers = []
    for i in range(NUM_LAYERS):
        lk = jax.random.split(keys[2 + i], 4)
        wqkv, bqkv = linear(lk[0], D, 3 * D)
        wo, bo = linear(lk[1], D, D)
        w1, bf1 = linear(lk[2], D, HIDDEN)
        w2, bf2 = linear(lk[3], HIDDEN, D)
        layers.append(dict(
            wqkv=wqkv, bqkv=bqkv, wo=wo, bo=bo,
            g1=jnp.ones((1, D), jnp.float32), be1=jnp.zeros((1, D), jnp.float32),
            w1=w1, bf1=bf1, w2=w2, bf2=bf2,
            g2=jnp.ones((1, D), jnp.float32), be2=jnp.zeros((1, D), jnp.float32)))
    return dict(w_in=w_in, b_in=b_in, w_out=w_out, b_out=b_out, layers=layers)


if __name__ == "__main__":
    key = jax.random.PRNGKey(0)
    kx, kp = jax.random.split(key)
    x = jax.random.normal(kx, (B, S, INP_FEATURES), jnp.float32)
    params = init_params(kp)
    pos_enc = jnp.asarray(positional_encoding_np(D, position=20))
    wslab, vslab = pack_params(params, pos_enc)

    out, attn = encoder_forward(x, wslab, vslab)
    out = jax.block_until_ready(out)
    attention_weights = {f"encoder_layer{i + 1}": attn[i] for i in range(NUM_LAYERS)}

    ref_out, ref_attn = reference_forward(x, params, pos_enc)
    np.testing.assert_allclose(np.asarray(out), np.asarray(ref_out),
                               rtol=2e-3, atol=2e-3)
    for i in range(NUM_LAYERS):
        np.testing.assert_allclose(
            np.asarray(attention_weights[f"encoder_layer{i + 1}"]),
            np.asarray(ref_attn[i]), rtol=2e-3, atol=2e-3)

    print("KERNEL_OK")
</pallas_src>

<mosaic_0001>
module attributes {stable_mosaic.version = 11 : i64} {
  func.func @_encoder_kernel(%arg0: i32, %arg1: memref<16x16xf32, #tpu.memory_space<vmem>>, %arg2: memref<480x96xf32, #tpu.memory_space<vmem>>, %arg3: memref<24x96xf32, #tpu.memory_space<vmem>>, %arg4: memref<16x16xf32, #tpu.memory_space<vmem>>, %arg5: memref<16x128xf32, #tpu.memory_space<vmem>>) attributes {dimension_semantics = [#tpu.dimension_semantics<arbitrary>], iteration_bounds = array<i64: 1>, scalar_prefetch = 0 : i64, scratch_operands = 0 : i64, tpu.core_type = #tpu.core_type<tc>, window_params = [{pipeline_mode = #tpu.pipeline_mode<synchronous>, transform_indices = @transform_0, window_bounds = array<i64: 16, 16>}, {pipeline_mode = #tpu.pipeline_mode<synchronous>, transform_indices = @transform_1, window_bounds = array<i64: 480, 96>}, {pipeline_mode = #tpu.pipeline_mode<synchronous>, transform_indices = @transform_2, window_bounds = array<i64: 24, 96>}, {pipeline_mode = #tpu.pipeline_mode<synchronous>, transform_indices = @transform_3, window_bounds = array<i64: 16, 16>}, {pipeline_mode = #tpu.pipeline_mode<synchronous>, transform_indices = @transform_4, window_bounds = array<i64: 16, 128>}]} {
    %c0 = arith.constant 0 : index
    %c0_0 = arith.constant 0 : index
    %0 = vector.load %arg2[%c0, %c0_0] : memref<480x96xf32, #tpu.memory_space<vmem>>, vector<16x32xf32>
    %c16 = arith.constant 16 : index
    %c0_1 = arith.constant 0 : index
    %1 = vector.load %arg2[%c16, %c0_1] : memref<480x96xf32, #tpu.memory_space<vmem>>, vector<16x32xf32>
    %c32 = arith.constant 32 : index
    %c0_2 = arith.constant 0 : index
    %2 = vector.load %arg2[%c32, %c0_2] : memref<480x96xf32, #tpu.memory_space<vmem>>, vector<16x64xf32>
    %c48 = arith.constant 48 : index
    %c0_3 = arith.constant 0 : index
    %3 = vector.load %arg2[%c48, %c0_3] : memref<480x96xf32, #tpu.memory_space<vmem>>, vector<64x32xf32>
    %c112 = arith.constant 112 : index
    %c0_4 = arith.constant 0 : index
    %4 = vector.load %arg2[%c112, %c0_4] : memref<480x96xf32, #tpu.memory_space<vmem>>, vector<16x16xf32>
    %c128 = arith.constant 128 : index
    %c0_5 = arith.constant 0 : index
    %5 = vector.load %arg2[%c128, %c0_5] : memref<480x96xf32, #tpu.memory_space<vmem>>, vector<32x16xf32>
    %c16_6 = arith.constant 16 : index
    %c0_7 = arith.constant 0 : index
    %6 = vector.load %arg3[%c16_6, %c0_7] : memref<24x96xf32, #tpu.memory_space<vmem>>, vector<1x16xf32>
    %c0_8 = arith.constant 0 : index
    %c0_9 = arith.constant 0 : index
    %7 = vector.load %arg1[%c0_8, %c0_9] : memref<16x16xf32, #tpu.memory_space<vmem>>, vector<16x16xf32>
    %cst = arith.constant dense<0.000000e+00> : vector<16x32xf32>
    %8 = tpu.matmul %7, %0, %cst {dimension_numbers = #tpu.dot_dimension_numbers<[1], [0], [0], [1], [0, 0, 1, 1], [], []>} : vector<16x16xf32>, vector<16x32xf32>, vector<16x32xf32> -> vector<16x32xf32>
    %9 = arith.addf %8, %1 : vector<16x32xf32>
    %c160 = arith.constant 160 : index
    %c0_10 = arith.constant 0 : index
    %10 = vector.load %arg2[%c160, %c0_10] : memref<480x96xf32, #tpu.memory_space<vmem>>, vector<32x96xf32>
    %c192 = arith.constant 192 : index
    %c0_11 = arith.constant 0 : index
    %11 = vector.load %arg2[%c192, %c0_11] : memref<480x96xf32, #tpu.memory_space<vmem>>, vector<32x32xf32>
    %c224 = arith.constant 224 : index
    %c0_12 = arith.constant 0 : index
    %12 = vector.load %arg2[%c224, %c0_12] : memref<480x96xf32, #tpu.memory_space<vmem>>, vector<32x64xf32>
    %c256 = arith.constant 256 : index
    %c0_13 = arith.constant 0 : index
    %13 = vector.load %arg2[%c256, %c0_13] : memref<480x96xf32, #tpu.memory_space<vmem>>, vector<64x32xf32>
    %c0_14 = arith.constant 0 : index
    %c0_15 = arith.constant 0 : index
    %14 = vector.load %arg3[%c0_14, %c0_15] : memref<24x96xf32, #tpu.memory_space<vmem>>, vector<1x96xf32>
    %c1 = arith.constant 1 : index
    %c0_16 = arith.constant 0 : index
    %15 = vector.load %arg3[%c1, %c0_16] : memref<24x96xf32, #tpu.memory_space<vmem>>, vector<1x32xf32>
    %c2 = arith.constant 2 : index
    %c0_17 = arith.constant 0 : index
    %16 = vector.load %arg3[%c2, %c0_17] : memref<24x96xf32, #tpu.memory_space<vmem>>, vector<1x64xf32>
    %c3 = arith.constant 3 : index
    %c0_18 = arith.constant 0 : index
    %17 = vector.load %arg3[%c3, %c0_18] : memref<24x96xf32, #tpu.memory_space<vmem>>, vector<1x32xf32>
    %c4 = arith.constant 4 : index
    %c0_19 = arith.constant 0 : index
    %18 = vector.load %arg3[%c4, %c0_19] : memref<24x96xf32, #tpu.memory_space<vmem>>, vector<1x32xf32>
    %c5 = arith.constant 5 : index
    %c0_20 = arith.constant 0 : index
    %19 = vector.load %arg3[%c5, %c0_20] : memref<24x96xf32, #tpu.memory_space<vmem>>, vector<1x32xf32>
    %c6 = arith.constant 6 : index
    %c0_21 = arith.constant 0 : index
    %20 = vector.load %arg3[%c6, %c0_21] : memref<24x96xf32, #tpu.memory_space<vmem>>, vector<1x32xf32>
    %c7 = arith.constant 7 : index
    %c0_22 = arith.constant 0 : index
    %21 = vector.load %arg3[%c7, %c0_22] : memref<24x96xf32, #tpu.memory_space<vmem>>, vector<1x32xf32>
    %cst_23 = arith.constant dense<0.000000e+00> : vector<16x96xf32>
    %22 = tpu.matmul %9, %10, %cst_23 {dimension_numbers = #tpu.dot_dimension_numbers<[1], [0], [0], [1], [0, 0, 1, 1], [], []>} : vector<16x32xf32>, vector<32x96xf32>, vector<16x96xf32> -> vector<16x96xf32>
    %23 = vector.broadcast %14 : vector<1x96xf32> to vector<16x96xf32>
    %24 = arith.addf %22, %23 : vector<16x96xf32>
    %25 = vector.extract_strided_slice %24 {offsets = [0, 0], sizes = [16, 8], strides = [1, 1]} : vector<16x96xf32> to vector<16x8xf32>
    %26 = vector.extract_strided_slice %24 {offsets = [0, 32], sizes = [16, 8], strides = [1, 1]} : vector<16x96xf32> to vector<16x8xf32>
    %27 = vector.extract_strided_slice %24 {offsets = [0, 64], sizes = [16, 8], strides = [1, 1]} : vector<16x96xf32> to vector<16x8xf32>
    %cst_24 = arith.constant dense<0.000000e+00> : vector<16x16xf32>
    %28 = tpu.matmul %25, %26, %cst_24 {dimension_numbers = #tpu.dot_dimension_numbers<[1], [1], [0], [0], [0, 0, 1, 0], [], []>} : vector<16x8xf32>, vector<16x8xf32>, vector<16x16xf32> -> vector<16x16xf32>
    %29 = arith.addf %28, %4 : vector<16x16xf32>
    %cst_25 = arith.constant dense<0xFF800000> : vector<16xf32>
    %30 = vector.multi_reduction <maximumf>, %29, %cst_25 [1] : vector<16x16xf32> to vector<16xf32>
    %31 = vector.shape_cast %30 : vector<16xf32> to vector<16x1xf32>
    %32 = vector.broadcast %31 : vector<16x1xf32> to vector<16x16xf32>
    %33 = arith.subf %29, %32 : vector<16x16xf32>
    %34 = math.exp %33 : vector<16x16xf32>
    %cst_26 = arith.constant dense<0.000000e+00> : vector<16xf32>
    %35 = vector.multi_reduction <add>, %34, %cst_26 [1] : vector<16x16xf32> to vector<16xf32>
    %36 = vector.shape_cast %35 : vector<16xf32> to vector<16x1xf32>
    %37 = vector.broadcast %36 : vector<16x1xf32> to vector<16x16xf32>
    %38 = arith.divf %34, %37 : vector<16x16xf32>
    %cst_27 = arith.constant dense<0.000000e+00> : vector<16x8xf32>
    %39 = tpu.matmul %38, %27, %cst_27 {dimension_numbers = #tpu.dot_dimension_numbers<[1], [0], [0], [1], [0, 0, 1, 1], [], []>} : vector<16x16xf32>, vector<16x8xf32>, vector<16x8xf32> -> vector<16x8xf32>
    %40 = vector.extract_strided_slice %24 {offsets = [0, 8], sizes = [16, 8], strides = [1, 1]} : vector<16x96xf32> to vector<16x8xf32>
    %41 = vector.extract_strided_slice %24 {offsets = [0, 40], sizes = [16, 8], strides = [1, 1]} : vector<16x96xf32> to vector<16x8xf32>
    %42 = vector.extract_strided_slice %24 {offsets = [0, 72], sizes = [16, 8], strides = [1, 1]} : vector<16x96xf32> to vector<16x8xf32>
    %cst_28 = arith.constant dense<0.000000e+00> : vector<16x16xf32>
    %43 = tpu.matmul %40, %41, %cst_28 {dimension_numbers = #tpu.dot_dimension_numbers<[1], [1], [0], [0], [0, 0, 1, 0], [], []>} : vector<16x8xf32>, vector<16x8xf32>, vector<16x16xf32> -> vector<16x16xf32>
    %44 = arith.addf %43, %4 : vector<16x16xf32>
    %cst_29 = arith.constant dense<0xFF800000> : vector<16xf32>
    %45 = vector.multi_reduction <maximumf>, %44, %cst_29 [1] : vector<16x16xf32> to vector<16xf32>
    %46 = vector.shape_cast %45 : vector<16xf32> to vector<16x1xf32>
    %47 = vector.broadcast %46 : vector<16x1xf32> to vector<16x16xf32>
    %48 = arith.subf %44, %47 : vector<16x16xf32>
    %49 = math.exp %48 : vector<16x16xf32>
    %cst_30 = arith.constant dense<0.000000e+00> : vector<16xf32>
    %50 = vector.multi_reduction <add>, %49, %cst_30 [1] : vector<16x16xf32> to vector<16xf32>
    %51 = vector.shape_cast %50 : vector<16xf32> to vector<16x1xf32>
    %52 = vector.broadcast %51 : vector<16x1xf32> to vector<16x16xf32>
    %53 = arith.divf %49, %52 : vector<16x16xf32>
    %cst_31 = arith.constant dense<0.000000e+00> : vector<16x8xf32>
    %54 = tpu.matmul %53, %42, %cst_31 {dimension_numbers = #tpu.dot_dimension_numbers<[1], [0], [0], [1], [0, 0, 1, 1], [], []>} : vector<16x16xf32>, vector<16x8xf32>, vector<16x8xf32> -> vector<16x8xf32>
    %55 = vector.extract_strided_slice %24 {offsets = [0, 16], sizes = [16, 8], strides = [1, 1]} : vector<16x96xf32> to vector<16x8xf32>
    %56 = vector.extract_strided_slice %24 {offsets = [0, 48], sizes = [16, 8], strides = [1, 1]} : vector<16x96xf32> to vector<16x8xf32>
    %57 = vector.extract_strided_slice %24 {offsets = [0, 80], sizes = [16, 8], strides = [1, 1]} : vector<16x96xf32> to vector<16x8xf32>
    %cst_32 = arith.constant dense<0.000000e+00> : vector<16x16xf32>
    %58 = tpu.matmul %55, %56, %cst_32 {dimension_numbers = #tpu.dot_dimension_numbers<[1], [1], [0], [0], [0, 0, 1, 0], [], []>} : vector<16x8xf32>, vector<16x8xf32>, vector<16x16xf32> -> vector<16x16xf32>
    %59 = arith.addf %58, %4 : vector<16x16xf32>
    %cst_33 = arith.constant dense<0xFF800000> : vector<16xf32>
    %60 = vector.multi_reduction <maximumf>, %59, %cst_33 [1] : vector<16x16xf32> to vector<16xf32>
    %61 = vector.shape_cast %60 : vector<16xf32> to vector<16x1xf32>
    %62 = vector.broadcast %61 : vector<16x1xf32> to vector<16x16xf32>
    %63 = arith.subf %59, %62 : vector<16x16xf32>
    %64 = math.exp %63 : vector<16x16xf32>
    %cst_34 = arith.constant dense<0.000000e+00> : vector<16xf32>
    %65 = vector.multi_reduction <add>, %64, %cst_34 [1] : vector<16x16xf32> to vector<16xf32>
    %66 = vector.shape_cast %65 : vector<16xf32> to vector<16x1xf32>
    %67 = vector.broadcast %66 : vector<16x1xf32> to vector<16x16xf32>
    %68 = arith.divf %64, %67 : vector<16x16xf32>
    %cst_35 = arith.constant dense<0.000000e+00> : vector<16x8xf32>
    %69 = tpu.matmul %68, %57, %cst_35 {dimension_numbers = #tpu.dot_dimension_numbers<[1], [0], [0], [1], [0, 0, 1, 1], [], []>} : vector<16x16xf32>, vector<16x8xf32>, vector<16x8xf32> -> vector<16x8xf32>
    %70 = vector.extract_strided_slice %24 {offsets = [0, 24], sizes = [16, 8], strides = [1, 1]} : vector<16x96xf32> to vector<16x8xf32>
    %71 = vector.extract_strided_slice %24 {offsets = [0, 56], sizes = [16, 8], strides = [1, 1]} : vector<16x96xf32> to vector<16x8xf32>
    %72 = vector.extract_strided_slice %24 {offsets = [0, 88], sizes = [16, 8], strides = [1, 1]} : vector<16x96xf32> to vector<16x8xf32>
    %cst_36 = arith.constant dense<0.000000e+00> : vector<16x16xf32>
    %73 = tpu.matmul %70, %71, %cst_36 {dimension_numbers = #tpu.dot_dimension_numbers<[1], [1], [0], [0], [0, 0, 1, 0], [], []>} : vector<16x8xf32>, vector<16x8xf32>, vector<16x16xf32> -> vector<16x16xf32>
    %74 = arith.addf %73, %4 : vector<16x16xf32>
    %cst_37 = arith.constant dense<0xFF800000> : vector<16xf32>
    %75 = vector.multi_reduction <maximumf>, %74, %cst_37 [1] : vector<16x16xf32> to vector<16xf32>
    %76 = vector.shape_cast %75 : vector<16xf32> to vector<16x1xf32>
    %77 = vector.broadcast %76 : vector<16x1xf32> to vector<16x16xf32>
    %78 = arith.subf %74, %77 : vector<16x16xf32>
    %79 = math.exp %78 : vector<16x16xf32>
    %cst_38 = arith.constant dense<0.000000e+00> : vector<16xf32>
    %80 = vector.multi_reduction <add>, %79, %cst_38 [1] : vector<16x16xf32> to vector<16xf32>
    %81 = vector.shape_cast %80 : vector<16xf32> to vector<16x1xf32>
    %82 = vector.broadcast %81 : vector<16x1xf32> to vector<16x16xf32>
    %83 = arith.divf %79, %82 : vector<16x16xf32>
    %cst_39 = arith.constant dense<0.000000e+00> : vector<16x8xf32>
    %84 = tpu.matmul %83, %72, %cst_39 {dimension_numbers = #tpu.dot_dimension_numbers<[1], [0], [0], [1], [0, 0, 1, 1], [], []>} : vector<16x16xf32>, vector<16x8xf32>, vector<16x8xf32> -> vector<16x8xf32>
    %85 = tpu.concatenate %39, %54, %69, %84 in 0 : vector<16x8xf32>, vector<16x8xf32>, vector<16x8xf32>, vector<16x8xf32> -> vector<64x8xf32>
    %86 = tpu.concatenate %85, %85, %85, %85 in 1 : vector<64x8xf32>, vector<64x8xf32>, vector<64x8xf32>, vector<64x8xf32> -> vector<64x32xf32>
    %87 = arith.mulf %86, %3 : vector<64x32xf32>
    %cst_40 = arith.constant dense<0.000000e+00> : vector<16x32xf32>
    %88 = tpu.matmul %2, %87, %cst_40 {dimension_numbers = #tpu.dot_dimension_numbers<[1], [0], [0], [1], [0, 0, 1, 1], [], []>} : vector<16x64xf32>, vector<64x32xf32>, vector<16x32xf32> -> vector<16x32xf32>
    %cst_41 = arith.constant dense<0.000000e+00> : vector<16x32xf32>
    %89 = tpu.matmul %88, %11, %cst_41 {dimension_numbers = #tpu.dot_dimension_numbers<[1], [0], [0], [1], [0, 0, 1, 1], [], []>} : vector<16x32xf32>, vector<32x32xf32>, vector<16x32xf32> -> vector<16x32xf32>
    %90 = vector.broadcast %15 : vector<1x32xf32> to vector<16x32xf32>
    %91 = arith.addf %89, %90 : vector<16x32xf32>
    %92 = arith.addf %91, %9 : vector<16x32xf32>
    %cst_42 = arith.constant dense<0.000000e+00> : vector<16xf32>
    %93 = vector.multi_reduction <add>, %92, %cst_42 [1] : vector<16x32xf32> to vector<16xf32>
    %94 = vector.shape_cast %93 : vector<16xf32> to vector<16x1xf32>
    %cst_43 = arith.constant 3.200000e+01 : f32
    %95 = vector.broadcast %cst_43 : f32 to vector<16x1xf32>
    %96 = arith.divf %94, %95 : vector<16x1xf32>
    %97 = vector.broadcast %96 : vector<16x1xf32> to vector<16x32xf32>
    %98 = arith.subf %92, %97 : vector<16x32xf32>
    %99 = arith.mulf %98, %98 : vector<16x32xf32>
    %cst_44 = arith.constant dense<0.000000e+00> : vector<16xf32>
    %100 = vector.multi_reduction <add>, %99, %cst_44 [1] : vector<16x32xf32> to vector<16xf32>
    %101 = vector.shape_cast %100 : vector<16xf32> to vector<16x1xf32>
    %cst_45 = arith.constant 3.200000e+01 : f32
    %102 = vector.broadcast %cst_45 : f32 to vector<16x1xf32>
    %103 = arith.divf %101, %102 : vector<16x1xf32>
    %104 = vector.broadcast %96 : vector<16x1xf32> to vector<16x32xf32>
    %105 = arith.subf %92, %104 : vector<16x32xf32>
    %cst_46 = arith.constant 9.99999971E-10 : f32
    %106 = vector.broadcast %cst_46 : f32 to vector<16x1xf32>
    %107 = arith.addf %103, %106 : vector<16x1xf32>
    %108 = math.rsqrt %107 : vector<16x1xf32>
    %109 = vector.broadcast %108 : vector<16x1xf32> to vector<16x32xf32>
    %110 = arith.mulf %105, %109 : vector<16x32xf32>
    %111 = vector.broadcast %18 : vector<1x32xf32> to vector<16x32xf32>
    %112 = arith.mulf %111, %110 : vector<16x32xf32>
    %113 = vector.broadcast %19 : vector<1x32xf32> to vector<16x32xf32>
    %114 = arith.addf %112, %113 : vector<16x32xf32>
    %cst_47 = arith.constant dense<0.000000e+00> : vector<16x64xf32>
    %115 = tpu.matmul %114, %12, %cst_47 {dimension_numbers = #tpu.dot_dimension_numbers<[1], [0], [0], [1], [0, 0, 1, 1], [], []>} : vector<16x32xf32>, vector<32x64xf32>, vector<16x64xf32> -> vector<16x64xf32>
    %116 = vector.broadcast %16 : vector<1x64xf32> to vector<16x64xf32>
    %117 = arith.addf %115, %116 : vector<16x64xf32>
    %cst_48 = arith.constant 0.000000e+00 : f32
    %118 = vector.broadcast %cst_48 : f32 to vector<16x64xf32>
    %119 = arith.maximumf %117, %118 : vector<16x64xf32>
    %cst_49 = arith.constant dense<0.000000e+00> : vector<16x32xf32>
    %120 = tpu.matmul %119, %13, %cst_49 {dimension_numbers = #tpu.dot_dimension_numbers<[1], [0], [0], [1], [0, 0, 1, 1], [], []>} : vector<16x64xf32>, vector<64x32xf32>, vector<16x32xf32> -> vector<16x32xf32>
    %121 = vector.broadcast %17 : vector<1x32xf32> to vector<16x32xf32>
    %122 = arith.addf %120, %121 : vector<16x32xf32>
    %123 = arith.addf %122, %114 : vector<16x32xf32>
    %cst_50 = arith.constant dense<0.000000e+00> : vector<16xf32>
    %124 = vector.multi_reduction <add>, %123, %cst_50 [1] : vector<16x32xf32> to vector<16xf32>
    %125 = vector.shape_cast %124 : vector<16xf32> to vector<16x1xf32>
    %cst_51 = arith.constant 3.200000e+01 : f32
    %126 = vector.broadcast %cst_51 : f32 to vector<16x1xf32>
    %127 = arith.divf %125, %126 : vector<16x1xf32>
    %128 = vector.broadcast %127 : vector<16x1xf32> to vector<16x32xf32>
    %129 = arith.subf %123, %128 : vector<16x32xf32>
    %130 = arith.mulf %129, %129 : vector<16x32xf32>
    %cst_52 = arith.constant dense<0.000000e+00> : vector<16xf32>
    %131 = vector.multi_reduction <add>, %130, %cst_52 [1] : vector<16x32xf32> to vector<16xf32>
    %132 = vector.shape_cast %131 : vector<16xf32> to vector<16x1xf32>
    %cst_53 = arith.constant 3.200000e+01 : f32
    %133 = vector.broadcast %cst_53 : f32 to vector<16x1xf32>
    %134 = arith.divf %132, %133 : vector<16x1xf32>
    %135 = vector.broadcast %127 : vector<16x1xf32> to vector<16x32xf32>
    %136 = arith.subf %123, %135 : vector<16x32xf32>
    %cst_54 = arith.constant 9.99999971E-10 : f32
    %137 = vector.broadcast %cst_54 : f32 to vector<16x1xf32>
    %138 = arith.addf %134, %137 : vector<16x1xf32>
    %139 = math.rsqrt %138 : vector<16x1xf32>
    %140 = vector.broadcast %139 : vector<16x1xf32> to vector<16x32xf32>
    %141 = arith.mulf %136, %140 : vector<16x32xf32>
    %142 = vector.broadcast %20 : vector<1x32xf32> to vector<16x32xf32>
    %143 = arith.mulf %142, %141 : vector<16x32xf32>
    %144 = vector.broadcast %21 : vector<1x32xf32> to vector<16x32xf32>
    %145 = arith.addf %143, %144 : vector<16x32xf32>
    %c320 = arith.constant 320 : index
    %c0_55 = arith.constant 0 : index
    %146 = vector.load %arg2[%c320, %c0_55] : memref<480x96xf32, #tpu.memory_space<vmem>>, vector<32x96xf32>
    %c352 = arith.constant 352 : index
    %c0_56 = arith.constant 0 : index
    %147 = vector.load %arg2[%c352, %c0_56] : memref<480x96xf32, #tpu.memory_space<vmem>>, vector<32x32xf32>
    %c384 = arith.constant 384 : index
    %c0_57 = arith.constant 0 : index
    %148 = vector.load %arg2[%c384, %c0_57] : memref<480x96xf32, #tpu.memory_space<vmem>>, vector<32x64xf32>
    %c416 = arith.constant 416 : index
    %c0_58 = arith.constant 0 : index
    %149 = vector.load %arg2[%c416, %c0_58] : memref<480x96xf32, #tpu.memory_space<vmem>>, vector<64x32xf32>
    %c8 = arith.constant 8 : index
    %c0_59 = arith.constant 0 : index
    %150 = vector.load %arg3[%c8, %c0_59] : memref<24x96xf32, #tpu.memory_space<vmem>>, vector<1x96xf32>
    %c9 = arith.constant 9 : index
    %c0_60 = arith.constant 0 : index
    %151 = vector.load %arg3[%c9, %c0_60] : memref<24x96xf32, #tpu.memory_space<vmem>>, vector<1x32xf32>
    %c10 = arith.constant 10 : index
    %c0_61 = arith.constant 0 : index
    %152 = vector.load %arg3[%c10, %c0_61] : memref<24x96xf32, #tpu.memory_space<vmem>>, vector<1x64xf32>
    %c11 = arith.constant 11 : index
    %c0_62 = arith.constant 0 : index
    %153 = vector.load %arg3[%c11, %c0_62] : memref<24x96xf32, #tpu.memory_space<vmem>>, vector<1x32xf32>
    %c12 = arith.constant 12 : index
    %c0_63 = arith.constant 0 : index
    %154 = vector.load %arg3[%c12, %c0_63] : memref<24x96xf32, #tpu.memory_space<vmem>>, vector<1x32xf32>
    %c13 = arith.constant 13 : index
    %c0_64 = arith.constant 0 : index
    %155 = vector.load %arg3[%c13, %c0_64] : memref<24x96xf32, #tpu.memory_space<vmem>>, vector<1x32xf32>
    %c14 = arith.constant 14 : index
    %c0_65 = arith.constant 0 : index
    %156 = vector.load %arg3[%c14, %c0_65] : memref<24x96xf32, #tpu.memory_space<vmem>>, vector<1x32xf32>
    %c15 = arith.constant 15 : index
    %c0_66 = arith.constant 0 : index
    %157 = vector.load %arg3[%c15, %c0_66] : memref<24x96xf32, #tpu.memory_space<vmem>>, vector<1x32xf32>
    %cst_67 = arith.constant dense<0.000000e+00> : vector<16x96xf32>
    %158 = tpu.matmul %145, %146, %cst_67 {dimension_numbers = #tpu.dot_dimension_numbers<[1], [0], [0], [1], [0, 0, 1, 1], [], []>} : vector<16x32xf32>, vector<32x96xf32>, vector<16x96xf32> -> vector<16x96xf32>
    %159 = vector.broadcast %150 : vector<1x96xf32> to vector<16x96xf32>
    %160 = arith.addf %158, %159 : vector<16x96xf32>
    %161 = vector.extract_strided_slice %160 {offsets = [0, 0], sizes = [16, 8], strides = [1, 1]} : vector<16x96xf32> to vector<16x8xf32>
    %162 = vector.extract_strided_slice %160 {offsets = [0, 32], sizes = [16, 8], strides = [1, 1]} : vector<16x96xf32> to vector<16x8xf32>
    %163 = vector.extract_strided_slice %160 {offsets = [0, 64], sizes = [16, 8], strides = [1, 1]} : vector<16x96xf32> to vector<16x8xf32>
    %cst_68 = arith.constant dense<0.000000e+00> : vector<16x16xf32>
    %164 = tpu.matmul %161, %162, %cst_68 {dimension_numbers = #tpu.dot_dimension_numbers<[1], [1], [0], [0], [0, 0, 1, 0], [], []>} : vector<16x8xf32>, vector<16x8xf32>, vector<16x16xf32> -> vector<16x16xf32>
    %165 = arith.addf %164, %4 : vector<16x16xf32>
    %cst_69 = arith.constant dense<0xFF800000> : vector<16xf32>
    %166 = vector.multi_reduction <maximumf>, %165, %cst_69 [1] : vector<16x16xf32> to vector<16xf32>
    %167 = vector.shape_cast %166 : vector<16xf32> to vector<16x1xf32>
    %168 = vector.broadcast %167 : vector<16x1xf32> to vector<16x16xf32>
    %169 = arith.subf %165, %168 : vector<16x16xf32>
    %170 = math.exp %169 : vector<16x16xf32>
    %cst_70 = arith.constant dense<0.000000e+00> : vector<16xf32>
    %171 = vector.multi_reduction <add>, %170, %cst_70 [1] : vector<16x16xf32> to vector<16xf32>
    %172 = vector.shape_cast %171 : vector<16xf32> to vector<16x1xf32>
    %173 = vector.broadcast %172 : vector<16x1xf32> to vector<16x16xf32>
    %174 = arith.divf %170, %173 : vector<16x16xf32>
    %cst_71 = arith.constant dense<0.000000e+00> : vector<16x8xf32>
    %175 = tpu.matmul %174, %163, %cst_71 {dimension_numbers = #tpu.dot_dimension_numbers<[1], [0], [0], [1], [0, 0, 1, 1], [], []>} : vector<16x16xf32>, vector<16x8xf32>, vector<16x8xf32> -> vector<16x8xf32>
    %176 = vector.extract_strided_slice %160 {offsets = [0, 8], sizes = [16, 8], strides = [1, 1]} : vector<16x96xf32> to vector<16x8xf32>
    %177 = vector.extract_strided_slice %160 {offsets = [0, 40], sizes = [16, 8], strides = [1, 1]} : vector<16x96xf32> to vector<16x8xf32>
    %178 = vector.extract_strided_slice %160 {offsets = [0, 72], sizes = [16, 8], strides = [1, 1]} : vector<16x96xf32> to vector<16x8xf32>
    %cst_72 = arith.constant dense<0.000000e+00> : vector<16x16xf32>
    %179 = tpu.matmul %176, %177, %cst_72 {dimension_numbers = #tpu.dot_dimension_numbers<[1], [1], [0], [0], [0, 0, 1, 0], [], []>} : vector<16x8xf32>, vector<16x8xf32>, vector<16x16xf32> -> vector<16x16xf32>
    %180 = arith.addf %179, %4 : vector<16x16xf32>
    %cst_73 = arith.constant dense<0xFF800000> : vector<16xf32>
    %181 = vector.multi_reduction <maximumf>, %180, %cst_73 [1] : vector<16x16xf32> to vector<16xf32>
    %182 = vector.shape_cast %181 : vector<16xf32> to vector<16x1xf32>
    %183 = vector.broadcast %182 : vector<16x1xf32> to vector<16x16xf32>
    %184 = arith.subf %180, %183 : vector<16x16xf32>
    %185 = math.exp %184 : vector<16x16xf32>
    %cst_74 = arith.constant dense<0.000000e+00> : vector<16xf32>
    %186 = vector.multi_reduction <add>, %185, %cst_74 [1] : vector<16x16xf32> to vector<16xf32>
    %187 = vector.shape_cast %186 : vector<16xf32> to vector<16x1xf32>
    %188 = vector.broadcast %187 : vector<16x1xf32> to vector<16x16xf32>
    %189 = arith.divf %185, %188 : vector<16x16xf32>
    %cst_75 = arith.constant dense<0.000000e+00> : vector<16x8xf32>
    %190 = tpu.matmul %189, %178, %cst_75 {dimension_numbers = #tpu.dot_dimension_numbers<[1], [0], [0], [1], [0, 0, 1, 1], [], []>} : vector<16x16xf32>, vector<16x8xf32>, vector<16x8xf32> -> vector<16x8xf32>
    %191 = vector.extract_strided_slice %160 {offsets = [0, 16], sizes = [16, 8], strides = [1, 1]} : vector<16x96xf32> to vector<16x8xf32>
    %192 = vector.extract_strided_slice %160 {offsets = [0, 48], sizes = [16, 8], strides = [1, 1]} : vector<16x96xf32> to vector<16x8xf32>
    %193 = vector.extract_strided_slice %160 {offsets = [0, 80], sizes = [16, 8], strides = [1, 1]} : vector<16x96xf32> to vector<16x8xf32>
    %cst_76 = arith.constant dense<0.000000e+00> : vector<16x16xf32>
    %194 = tpu.matmul %191, %192, %cst_76 {dimension_numbers = #tpu.dot_dimension_numbers<[1], [1], [0], [0], [0, 0, 1, 0], [], []>} : vector<16x8xf32>, vector<16x8xf32>, vector<16x16xf32> -> vector<16x16xf32>
    %195 = arith.addf %194, %4 : vector<16x16xf32>
    %cst_77 = arith.constant dense<0xFF800000> : vector<16xf32>
    %196 = vector.multi_reduction <maximumf>, %195, %cst_77 [1] : vector<16x16xf32> to vector<16xf32>
    %197 = vector.shape_cast %196 : vector<16xf32> to vector<16x1xf32>
    %198 = vector.broadcast %197 : vector<16x1xf32> to vector<16x16xf32>
    %199 = arith.subf %195, %198 : vector<16x16xf32>
    %200 = math.exp %199 : vector<16x16xf32>
    %cst_78 = arith.constant dense<0.000000e+00> : vector<16xf32>
    %201 = vector.multi_reduction <add>, %200, %cst_78 [1] : vector<16x16xf32> to vector<16xf32>
    %202 = vector.shape_cast %201 : vector<16xf32> to vector<16x1xf32>
    %203 = vector.broadcast %202 : vector<16x1xf32> to vector<16x16xf32>
    %204 = arith.divf %200, %203 : vector<16x16xf32>
    %cst_79 = arith.constant dense<0.000000e+00> : vector<16x8xf32>
    %205 = tpu.matmul %204, %193, %cst_79 {dimension_numbers = #tpu.dot_dimension_numbers<[1], [0], [0], [1], [0, 0, 1, 1], [], []>} : vector<16x16xf32>, vector<16x8xf32>, vector<16x8xf32> -> vector<16x8xf32>
    %206 = vector.extract_strided_slice %160 {offsets = [0, 24], sizes = [16, 8], strides = [1, 1]} : vector<16x96xf32> to vector<16x8xf32>
    %207 = vector.extract_strided_slice %160 {offsets = [0, 56], sizes = [16, 8], strides = [1, 1]} : vector<16x96xf32> to vector<16x8xf32>
    %208 = vector.extract_strided_slice %160 {offsets = [0, 88], sizes = [16, 8], strides = [1, 1]} : vector<16x96xf32> to vector<16x8xf32>
    %cst_80 = arith.constant dense<0.000000e+00> : vector<16x16xf32>
    %209 = tpu.matmul %206, %207, %cst_80 {dimension_numbers = #tpu.dot_dimension_numbers<[1], [1], [0], [0], [0, 0, 1, 0], [], []>} : vector<16x8xf32>, vector<16x8xf32>, vector<16x16xf32> -> vector<16x16xf32>
    %210 = arith.addf %209, %4 : vector<16x16xf32>
    %cst_81 = arith.constant dense<0xFF800000> : vector<16xf32>
    %211 = vector.multi_reduction <maximumf>, %210, %cst_81 [1] : vector<16x16xf32> to vector<16xf32>
    %212 = vector.shape_cast %211 : vector<16xf32> to vector<16x1xf32>
    %213 = vector.broadcast %212 : vector<16x1xf32> to vector<16x16xf32>
    %214 = arith.subf %210, %213 : vector<16x16xf32>
    %215 = math.exp %214 : vector<16x16xf32>
    %cst_82 = arith.constant dense<0.000000e+00> : vector<16xf32>
    %216 = vector.multi_reduction <add>, %215, %cst_82 [1] : vector<16x16xf32> to vector<16xf32>
    %217 = vector.shape_cast %216 : vector<16xf32> to vector<16x1xf32>
    %218 = vector.broadcast %217 : vector<16x1xf32> to vector<16x16xf32>
    %219 = arith.divf %215, %218 : vector<16x16xf32>
    %cst_83 = arith.constant dense<0.000000e+00> : vector<16x8xf32>
    %220 = tpu.matmul %219, %208, %cst_83 {dimension_numbers = #tpu.dot_dimension_numbers<[1], [0], [0], [1], [0, 0, 1, 1], [], []>} : vector<16x16xf32>, vector<16x8xf32>, vector<16x8xf32> -> vector<16x8xf32>
    %221 = tpu.concatenate %175, %190, %205, %220 in 0 : vector<16x8xf32>, vector<16x8xf32>, vector<16x8xf32>, vector<16x8xf32> -> vector<64x8xf32>
    %222 = tpu.concatenate %221, %221, %221, %221 in 1 : vector<64x8xf32>, vector<64x8xf32>, vector<64x8xf32>, vector<64x8xf32> -> vector<64x32xf32>
    %223 = arith.mulf %222, %3 : vector<64x32xf32>
    %cst_84 = arith.constant dense<0.000000e+00> : vector<16x32xf32>
    %224 = tpu.matmul %2, %223, %cst_84 {dimension_numbers = #tpu.dot_dimension_numbers<[1], [0], [0], [1], [0, 0, 1, 1], [], []>} : vector<16x64xf32>, vector<64x32xf32>, vector<16x32xf32> -> vector<16x32xf32>
    %cst_85 = arith.constant dense<0.000000e+00> : vector<16x32xf32>
    %225 = tpu.matmul %224, %147, %cst_85 {dimension_numbers = #tpu.dot_dimension_numbers<[1], [0], [0], [1], [0, 0, 1, 1], [], []>} : vector<16x32xf32>, vector<32x32xf32>, vector<16x32xf32> -> vector<16x32xf32>
    %226 = vector.broadcast %151 : vector<1x32xf32> to vector<16x32xf32>
    %227 = arith.addf %225, %226 : vector<16x32xf32>
    %228 = arith.addf %227, %145 : vector<16x32xf32>
    %cst_86 = arith.constant dense<0.000000e+00> : vector<16xf32>
    %229 = vector.multi_reduction <add>, %228, %cst_86 [1] : vector<16x32xf32> to vector<16xf32>
    %230 = vector.shape_cast %229 : vector<16xf32> to vector<16x1xf32>
    %cst_87 = arith.constant 3.200000e+01 : f32
    %231 = vector.broadcast %cst_87 : f32 to vector<16x1xf32>
    %232 = arith.divf %230, %231 : vector<16x1xf32>
    %233 = vector.broadcast %232 : vector<16x1xf32> to vector<16x32xf32>
    %234 = arith.subf %228, %233 : vector<16x32xf32>
    %235 = arith.mulf %234, %234 : vector<16x32xf32>
    %cst_88 = arith.constant dense<0.000000e+00> : vector<16xf32>
    %236 = vector.multi_reduction <add>, %235, %cst_88 [1] : vector<16x32xf32> to vector<16xf32>
    %237 = vector.shape_cast %236 : vector<16xf32> to vector<16x1xf32>
    %cst_89 = arith.constant 3.200000e+01 : f32
    %238 = vector.broadcast %cst_89 : f32 to vector<16x1xf32>
    %239 = arith.divf %237, %238 : vector<16x1xf32>
    %240 = vector.broadcast %232 : vector<16x1xf32> to vector<16x32xf32>
    %241 = arith.subf %228, %240 : vector<16x32xf32>
    %cst_90 = arith.constant 9.99999971E-10 : f32
    %242 = vector.broadcast %cst_90 : f32 to vector<16x1xf32>
    %243 = arith.addf %239, %242 : vector<16x1xf32>
    %244 = math.rsqrt %243 : vector<16x1xf32>
    %245 = vector.broadcast %244 : vector<16x1xf32> to vector<16x32xf32>
    %246 = arith.mulf %241, %245 : vector<16x32xf32>
    %247 = vector.broadcast %154 : vector<1x32xf32> to vector<16x32xf32>
    %248 = arith.mulf %247, %246 : vector<16x32xf32>
    %249 = vector.broadcast %155 : vector<1x32xf32> to vector<16x32xf32>
    %250 = arith.addf %248, %249 : vector<16x32xf32>
    %cst_91 = arith.constant dense<0.000000e+00> : vector<16x64xf32>
    %251 = tpu.matmul %250, %148, %cst_91 {dimension_numbers = #tpu.dot_dimension_numbers<[1], [0], [0], [1], [0, 0, 1, 1], [], []>} : vector<16x32xf32>, vector<32x64xf32>, vector<16x64xf32> -> vector<16x64xf32>
    %252 = vector.broadcast %152 : vector<1x64xf32> to vector<16x64xf32>
    %253 = arith.addf %251, %252 : vector<16x64xf32>
    %cst_92 = arith.constant 0.000000e+00 : f32
    %254 = vector.broadcast %cst_92 : f32 to vector<16x64xf32>
    %255 = arith.maximumf %253, %254 : vector<16x64xf32>
    %cst_93 = arith.constant dense<0.000000e+00> : vector<16x32xf32>
    %256 = tpu.matmul %255, %149, %cst_93 {dimension_numbers = #tpu.dot_dimension_numbers<[1], [0], [0], [1], [0, 0, 1, 1], [], []>} : vector<16x64xf32>, vector<64x32xf32>, vector<16x32xf32> -> vector<16x32xf32>
    %257 = vector.broadcast %153 : vector<1x32xf32> to vector<16x32xf32>
    %258 = arith.addf %256, %257 : vector<16x32xf32>
    %259 = arith.addf %258, %250 : vector<16x32xf32>
    %cst_94 = arith.constant dense<0.000000e+00> : vector<16xf32>
    %260 = vector.multi_reduction <add>, %259, %cst_94 [1] : vector<16x32xf32> to vector<16xf32>
    %261 = vector.shape_cast %260 : vector<16xf32> to vector<16x1xf32>
    %cst_95 = arith.constant 3.200000e+01 : f32
    %262 = vector.broadcast %cst_95 : f32 to vector<16x1xf32>
    %263 = arith.divf %261, %262 : vector<16x1xf32>
    %264 = vector.broadcast %263 : vector<16x1xf32> to vector<16x32xf32>
    %265 = arith.subf %259, %264 : vector<16x32xf32>
    %266 = arith.mulf %265, %265 : vector<16x32xf32>
    %cst_96 = arith.constant dense<0.000000e+00> : vector<16xf32>
    %267 = vector.multi_reduction <add>, %266, %cst_96 [1] : vector<16x32xf32> to vector<16xf32>
    %268 = vector.shape_cast %267 : vector<16xf32> to vector<16x1xf32>
    %cst_97 = arith.constant 3.200000e+01 : f32
    %269 = vector.broadcast %cst_97 : f32 to vector<16x1xf32>
    %270 = arith.divf %268, %269 : vector<16x1xf32>
    %271 = vector.broadcast %263 : vector<16x1xf32> to vector<16x32xf32>
    %272 = arith.subf %259, %271 : vector<16x32xf32>
    %cst_98 = arith.constant 9.99999971E-10 : f32
    %273 = vector.broadcast %cst_98 : f32 to vector<16x1xf32>
    %274 = arith.addf %270, %273 : vector<16x1xf32>
    %275 = math.rsqrt %274 : vector<16x1xf32>
    %276 = vector.broadcast %275 : vector<16x1xf32> to vector<16x32xf32>
    %277 = arith.mulf %272, %276 : vector<16x32xf32>
    %278 = vector.broadcast %156 : vector<1x32xf32> to vector<16x32xf32>
    %279 = arith.mulf %278, %277 : vector<16x32xf32>
    %280 = vector.broadcast %157 : vector<1x32xf32> to vector<16x32xf32>
    %281 = arith.addf %279, %280 : vector<16x32xf32>
    %cst_99 = arith.constant dense<0.000000e+00> : vector<16x16xf32>
    %282 = tpu.matmul %281, %5, %cst_99 {dimension_numbers = #tpu.dot_dimension_numbers<[1], [0], [0], [1], [0, 0, 1, 1], [], []>} : vector<16x32xf32>, vector<32x16xf32>, vector<16x16xf32> -> vector<16x16xf32>
    %283 = vector.broadcast %6 : vector<1x16xf32> to vector<16x16xf32>
    %284 = arith.addf %282, %283 : vector<16x16xf32>
    %c0_100 = arith.constant 0 : index
    %c0_101 = arith.constant 0 : index
    %285 = vector.load %arg4[%c0_100, %c0_101] : memref<16x16xf32, #tpu.memory_space<vmem>>, vector<16x16xf32>
    tpu.vector_store %arg4[%c0_100, %c0_101], %284 {strides = array<i32>} : memref<16x16xf32, #tpu.memory_space<vmem>>, vector<16x16xf32>,
    %286 = tpu.concatenate %38, %53, %68, %83, %174, %189, %204, %219 in 1 : vector<16x16xf32>, vector<16x16xf32>, vector<16x16xf32>, vector<16x16xf32>, vector<16x16xf32>, vector<16x16xf32>, vector<16x16xf32>, vector<16x16xf32> -> vector<16x128xf32>
    %c0_102 = arith.constant 0 : index
    %c0_103 = arith.constant 0 : index
    %287 = vector.load %arg5[%c0_102, %c0_103] : memref<16x128xf32, #tpu.memory_space<vmem>>, vector<16x128xf32>
    tpu.vector_store %arg5[%c0_102, %c0_103], %286 {strides = array<i32>} : memref<16x128xf32, #tpu.memory_space<vmem>>, vector<16x128xf32>,
    return
  }
  func.func @transform_0(%arg0: i32) -> (i32, i32) {
    %c0_i32 = arith.constant 0 : i32
    %c0_i32_0 = arith.constant 0 : i32
    %c0_i32_1 = arith.constant 0 : i32
    return %c0_i32, %c0_i32_0 : i32, i32
  }
  func.func @transform_1(%arg0: i32) -> (i32, i32) {
    %c0_i32 = arith.constant 0 : i32
    %c0_i32_0 = arith.constant 0 : i32
    %c0_i32_1 = arith.constant 0 : i32
    return %c0_i32, %c0_i32_0 : i32, i32
  }
  func.func @transform_2(%arg0: i32) -> (i32, i32) {
    %c0_i32 = arith.constant 0 : i32
    %c0_i32_0 = arith.constant 0 : i32
    %c0_i32_1 = arith.constant 0 : i32
    return %c0_i32, %c0_i32_0 : i32, i32
  }
  func.func @transform_3(%arg0: i32) -> (i32, i32) {
    %c0_i32 = arith.constant 0 : i32
    %c0_i32_0 = arith.constant 0 : i32
    %c0_i32_1 = arith.constant 0 : i32
    return %c0_i32, %c0_i32_0 : i32, i32
  }
  func.func @transform_4(%arg0: i32) -> (i32, i32) {
    %c0_i32 = arith.constant 0 : i32
    %c0_i32_0 = arith.constant 0 : i32
    %c0_i32_1 = arith.constant 0 : i32
    return %c0_i32, %c0_i32_0 : i32, i32
  }
}

</mosaic_0001>

<bundles_post_ra>
// kernel: encoder_forward.1
= control target key start
LH: loop header
LB: loop body
LE: loop exit
PB: predicated region body
PF: predicated region fallthrough
CT: control target
= control target key end

     0   :  { %vm39_vm0 = vcmask 130048   ;;  %vm153_vm1 = vcmask 261120   ;;  %vm241_vm2 = vcmask 64512   ;;  %s4051_s10 = smov 120   ;;  %s4052_s11 = smov 96   ;;  %vm1130_vm4 = vcmask 195584   ;;  %s4896_s1 = inlined_call_operand.vmem [shape: f32[480,96], index: 1, kind: input, shape index: {}]   ;;  %s4897_s0 = inlined_call_operand.vmem [shape: f32[16,16], index: 0, kind: input, shape index: {}]   ;;  %s4898_s2 = inlined_call_operand.vmem [shape: f32[24,96], index: 2, kind: input, shape index: {}]   ;;  %s4899_s4 = inlined_call_operand.vmem [shape: f32[16,128], index: 4, kind: output, shape index: {1}]   ;;  %s4900_s3 = inlined_call_operand.vmem [shape: f32[16,16], index: 3, kind: output, shape index: {0}]  }
   0x1   :  { %v16_v0 = vld [vmem:[%s4896_s1] sm:$0xff]  ;;  %v17_v1 = vld [vmem:[%s4896_s1 + $0x8] sm:$0xff]  ;;  %v123_v8 = vld [vmem:[%s4896_s1 + $0xb0] sm:$0xff]  ;;  %s4053_s12 = smov 88   ;;  %s4054_s17 = smov 64   ;;  %vm1147_vm5 = vcmask 523264  }
   0x2   :  { %v37_v2 = vld [vmem:[%s4897_s0] sm:$0xff]  ;;  %v3670_v3 = vpack.c.bf16 %v17_v1, %v16_v0  ;;  %v122_v5 = vld [vmem:[%s4896_s1 + $0xa8] sm:$0xff]  ;;  %v124_v9 = vld [vmem:[%s4896_s1 + $0xb8] sm:$0xff]  ;;  %s4055_s18 = smov 80   ;;  %s4056_s19 = smov 56   ;;  %vm3135_vm6 = vcmask 392192  }
   0x3   :  { %3402 = vmatprep.mubr.msk.f32.mxu0 %vm39_vm0, %v37_v2  ;;  %v121_v4 = vld [vmem:[%s4896_s1 + $0xa0] sm:$0xff]  ;;  %v38_v7 = vld [vmem:[%s4897_s0 + $0x8] sm:$0xff]  ;;  %v3678_v10 = vpack.c.bf16 %v124_v9, %v123_v8  ;;  %v18_v11 = vld [vmem:[%s4896_s1 + $0x10] sm:$0xff]  ;;  %s4057_s20 = smov 112   ;;  %s4058_s21 = smov 72   ;;  %vm3140_vm7 = vcmask 654336  }
   0x4   :  { %v3674_v6 = vpack.c.bf16 %v122_v5, %v121_v4  ;;  %3671 = vmatprep.subr.bf16.mxu0 %v3670_v3  ;;  %v19_v12 = vld [vmem:[%s4896_s1 + $0x18] sm:$0xff]  ;;  %v3161_v17 = vld [vmem:[%s4898_s2] ss:$0 sm:$0xff]  ;;  %vm4154_vm3 = vmpackc.low %vm241_vm2, %vm241_vm2  ;;  %s4059_s22 = smov 104   ;;  %s4060_s23 = smov 48   ;;  %vm3143_vm8 = vcmask 785408  }
   0x5   :  { %3673 = vmatpush3.bf16.msra.mxu0 %v3670_v3  ;;  %v4173_v34 = vld [vmem:[%s4896_s1 + $0x78] sm:$0xff]  ;;  %v4178_v35 = vld [vmem:[%s4896_s1 + $0x70] sm:$0xff]  ;;  %s4061_s24 = smov 8   ;;  %s4062_s25 = smov 40   ;;  %vm3146_vm9 = vcmask 916480  }
   0x6   :  { %3675 = vmatprep.subr.bf16.mxu1 %v3674_v6  ;;  %s4063_s26 = smov 16   ;;  %s4064_s27 = smov 24  }
   0x7   :  { %3677 = vmatpush3.bf16.msra.mxu1 %v3674_v6 }
   0x8   :  { %3403 = vmatmul.mubr.msk.f32.vlgmr.msra.gmra.mrb[0].mxu0 %vm39_vm0, %v38_v7  ;;  %3679 = vmatprep.subr.bf16.mxu1 %v3678_v10 }
   0xb   :  { %3681 = vmatpush3.bf16.msra.mxu1 %v3678_v10 }
  0xdb   :  { %v3404_v13 = vpop.f32.mrb[0].mxu0 }
  0xdc   :  { %v112_v14 = vpop.f32.mrb[1].mxu0  ;;  %v4125_v16 = vadd.f32 %v3404_v13, %v19_v12 }
  0xdd   :  { %v4123_v15 = vadd.f32 %v112_v14, %v18_v11 }
  0xdf   :  { %3413 = vmatprep.mubr.msk.f32.mxu1 %vm153_vm1, %v4123_v15 }
  0xe0   :  { %3414 = vmatmul.mubr.msk.f32.vlgmr.msra.gmra.mrb[0].mxu1 %vm153_vm1, %v4125_v16 }
 0x1b3   :  { %v3415_v18 = vpop.f32.mrb[0].mxu1 }
 0x1b4   :  { %v4134_v19 = vadd.f32 %v3415_v18, %v3161_v17  ;;  %v226_v20 = vpop.f32.mrb[1].mxu1 }
 0x1b5   :  { %v4136_v21 = vadd.f32 %v3161_v17, %v226_v20 }
 0x1b7   :  { %434 = vrot.lane.b32.xlu1 %v4136_v21, %s4051_s10  ;;  %3420 = vmatprep.mubr.msk.f32.mxu0 %vm241_vm2, %v4136_v21  ;;  %v4144_v22 = vpack.i.bf16 %v4134_v19, %v4136_v21 }
 0x1b9   :  { %3890 = vrot.lane.b32.xlu0 %v4144_v22, %s4052_s11 }
 0x1bb   :  { %436 = vrot.lane.b32.xlu1 %v4134_v19, %s4051_s10 }
 0x1bd   :  { %3895 = vrot.lane.b32.xlu0 %v4144_v22, %s4053_s12 }
 0x229   :  { %v435_v32 = vpop.permute.xlu1 %434 }
 0x22b   :  { %v3891_v23 = vpop.permute.xlu0 %3890 }
 0x22c   :  { %v3893_v24 = vunpack.i.h.bf16 %v3891_v23  ;;  %v3892_v25 = vunpack.i.l.bf16 %v3891_v23 }
 0x22d   :  { %v437_v33 = vpop.permute.xlu1 %436 }
 0x22e   :  { %v3682_v27 = vpack.c.bf16 %v3893_v24, %v3892_v25 }
 0x22f   :  { %v3896_v28 = vpop.permute.xlu0 %3895 }
 0x230   :  { %v3898_v29 = vunpack.i.h.bf16 %v3896_v28  ;;  %v3897_v30 = vunpack.i.l.bf16 %v3896_v28  ;;  %3684 = vmatprep.subr.msk.bf16.mxu0 %vm4154_vm3, %v3682_v27 }
 0x231   :  { %3687 = vmatpush3.bf16.xpose.msk.msra.mxu0 %vm4154_vm3, %v3682_v27 }
 0x232   :  { %v3692_v31 = vpack.c.bf16 %v3898_v29, %v3897_v30 }
 0x234   :  { %3694 = vmatprep.subr.msk.bf16.mxu0 %vm4154_vm3, %v3692_v31 }
 0x238   :  { %3421 = vmatmul.mubr.msk.f32.vlgmr.msra.gmra.mrb[2].mxu0 %vm241_vm2, %v4134_v19 }
 0x239   :  { %3697 = vmatpush3.bf16.xpose.msk.msra.mxu0 %vm4154_vm3, %v3692_v31  ;;  %3434 = vmatprep.mubr.msk.f32.mxu0 %vm241_vm2, %v435_v32 }
 0x240   :  { %3435 = vmatmul.mubr.msk.f32.vlgmr.msra.gmra.mrb[4].mxu0 %vm241_vm2, %v437_v33 }
 0x30b   :  { %v3422_v36 = vpop.f32.mrb[2].mxu0 }
 0x30c   :  { %v322_v37 = vadd.f32 %v3422_v36, %v4173_v34  ;;  %v316_v38 = vpop.f32.mrb[3].mxu0 }
 0x30d   :  { %v317_v39 = vadd.f32 %v316_v38, %v4178_v35 }
 0x30e   :  { %v328_v40 = vsel %vm39_vm0, %v322_v37, -inf }
 0x30f   :  { %329 = vmax.xlane.f32.xlu1 %v328_v40  ;;  %v325_v41 = vsel %vm39_vm0, %v317_v39, -inf }
 0x310   :  { %326 = vmax.xlane.f32.xlu0 %v325_v41 }
 0x313   :  { %v3436_v42 = vpop.f32.mrb[4].mxu0 }
 0x314   :  { %v516_v43 = vpop.f32.mrb[5].mxu0  ;;  %v522_v45 = vadd.f32 %v3436_v42, %v4173_v34 }
 0x315   :  { %v517_v44 = vadd.f32 %v516_v43, %v4178_v35 }
 0x316   :  { %v528_v47 = vsel %vm39_vm0, %v522_v45, -inf }
 0x317   :  { %v525_v46 = vsel %vm39_vm0, %v517_v44, -inf }
 0x318   :  { %526 = vmax.xlane.f32.xlu0 %v525_v46 }
 0x31c   :  { %529 = vmax.xlane.f32.xlu0 %v528_v47 }
 0x320   :  { %3900 = vrot.lane.b32.xlu1 %v4144_v22, %s4054_s17 }
 0x39c   :  { %v330_v48 = vpop.xlane.xlu1 %329 }
 0x39d   :  { %v332_v49 = vsub.f32 %v322_v37, %v330_v48  ;;  %v327_v50 = vpop.xlane.xlu0 %326 }
 0x39e   :  { %v331_v51 = vsub.f32 %v317_v39, %v327_v50 }
 0x39f   :  { %v335_v52 = vmul.f32 1.442695, %v332_v49 }
 0x3a0   :  { %v333_v53 = vmul.f32 1.442695, %v331_v51  ;;  %v3901_v54 = vpop.permute.xlu1 %3900 }
 0x3a1   :  { %3969 = vpow2.f32 %v335_v52  ;;  %v3903_v55 = vunpack.i.h.bf16 %v3901_v54  ;;  %v3902_v56 = vunpack.i.l.bf16 %v3901_v54 }
 0x3a2   :  { %3971 = vpow2.f32 %v333_v53 }
 0x3a3   :  { %v3688_v57 = vpack.c.bf16 %v3903_v55, %v3902_v56 }
 0x3a5   :  { %3689 = vmatprep.subr.bf16.mxu1 %v3688_v57  ;;  %v527_v58 = vpop.xlane.xlu0 %526 }
 0x3a6   :  { %3691 = vmatpush3.bf16.msra.mxu1 %v3688_v57  ;;  %v531_v4 = vsub.f32 %v517_v44, %v527_v58 }
 0x3a8   :  { %v533_v5 = vmul.f32 1.442695, %v531_v4 }
 0x3a9   :  { %v530_v59 = vpop.xlane.xlu0 %529 }
 0x3aa   :  { %v532_v60 = vsub.f32 %v522_v45, %v530_v59 }
 0x3ab   :  { %v3970_v61 = vpop.eup %3969 }
 0x3ac   :  { %v3972_v62 = vpop.eup %3971  ;;  %v535_v63 = vmul.f32 1.442695, %v532_v60  ;;  %v340_v0 = vsel %vm39_vm0, %v3970_v61, 0.0 }
 0x3ad   :  { %341 = vadd.xlane.f32.xlu0 %v340_v0  ;;  %v337_v1 = vsel %vm39_vm0, %v3972_v62, 0.0 }
 0x3ae   :  { %3973 = vpow2.f32 %v535_v63  ;;  %338 = vadd.xlane.f32.xlu1 %v337_v1 }
 0x3af   :  { %3975 = vpow2.f32 %v533_v5 }
 0x3b8   :  { %v3974_v2 = vpop.eup %3973 }
 0x3b9   :  { %v540_v3 = vsel %vm39_vm0, %v3974_v2, 0.0  ;;  %v3976_v6 = vpop.eup %3975 }
 0x3ba   :  { %541 = vadd.xlane.f32.xlu0 %v540_v3  ;;  %v537_v7 = vsel %vm39_vm0, %v3976_v6, 0.0 }
 0x3bf   :  { %3910 = vrot.lane.b32.xlu1 %v4144_v22, %s4055_s18 }
 0x3d0   :  { %3905 = vrot.lane.b32.xlu0 %v4144_v22, %s4056_s19 }
 0x3d4   :  { %636 = vrot.lane.b32.xlu0 %v4134_v19, %s4057_s20 }
 0x3e3   :  { %538 = vadd.xlane.f32.xlu1 %v537_v7 }
 0x3f4   :  { %634 = vrot.lane.b32.xlu1 %v4136_v21, %s4057_s20 }
 0x43a   :  { %v342_v8 = vpop.xlane.xlu0 %341 }
 0x43b   :  { %3977 = vrcp.f32 %v342_v8  ;;  %v339_v9 = vpop.xlane.xlu1 %338 }
 0x43c   :  { %3979 = vrcp.f32 %v339_v9 }
 0x43f   :  { %v3911_v17 = vpop.permute.xlu1 %3910 }
 0x440   :  { %v3913_v20 = vunpack.i.h.bf16 %v3911_v17  ;;  %v3912_v23 = vunpack.i.l.bf16 %v3911_v17 }
 0x442   :  { %v3702_v28 = vpack.c.bf16 %v3913_v20, %v3912_v23 }
 0x445   :  { %v3978_v10 = vpop.eup %3977 }
 0x446   :  { %v3980_v11 = vpop.eup %3979  ;;  %v4204_v14 = vmul.f32 %v3978_v10, %v3970_v61 }
 0x447   :  { %v542_v12 = vpop.xlane.xlu0 %541  ;;  %v4202_v13 = vmul.f32 %v3980_v11, %v3972_v62 }
 0x448   :  { %3981 = vrcp.f32 %v542_v12 }
 0x449   :  { %3427 = vmatprep.mubr.msk.f32.mxu1 %vm39_vm0, %v4202_v13 }
 0x44a   :  { %3428 = vmatmul.mubr.msk.f32.vlgmr.msra.gmra.mrb[2].mxu1 %vm39_vm0, %v4204_v14 }
 0x44b   :  { %v3906_v18 = vpop.permute.xlu0 %3905 }
 0x44c   :  { %v3908_v24 = vunpack.i.h.bf16 %v3906_v18  ;;  %v3907_v25 = vunpack.i.l.bf16 %v3906_v18 }
 0x44e   :  { %v3698_v27 = vpack.c.bf16 %v3908_v24, %v3907_v25 }
 0x44f   :  { %v637_v37 = vpop.permute.xlu0 %636 }
 0x450   :  { %3699 = vmatprep.subr.bf16.mxu1 %v3698_v27 }
 0x451   :  { %3701 = vmatpush3.bf16.msra.mxu1 %v3698_v27 }
 0x452   :  { %3704 = vmatprep.subr.msk.bf16.mxu1 %vm4154_vm3, %v3702_v28  ;;  %v3982_v30 = vpop.eup %3981 }
 0x453   :  { %v4214_v33 = vmul.f32 %v3982_v30, %v3974_v2 }
 0x470   :  { %v539_v29 = vpop.xlane.xlu1 %538 }
 0x471   :  { %3983 = vrcp.f32 %v539_v29 }
 0x474   :  { %v635_v36 = vpop.permute.xlu1 %634 }
 0x47b   :  { %v3984_v31 = vpop.eup %3983 }
 0x47c   :  { %v4212_v32 = vmul.f32 %v3984_v31, %v3976_v6 }
 0x47e   :  { %3441 = vmatprep.mubr.msk.f32.mxu1 %vm39_vm0, %v4212_v32 }
 0x47f   :  { %3442 = vmatmul.mubr.msk.f32.vlgmr.msra.gmra.mrb[4].mxu1 %vm39_vm0, %v4214_v33 }
 0x480   :  { %3707 = vmatpush3.bf16.xpose.msk.msra.mxu1 %vm4154_vm3, %v3702_v28  ;;  %3448 = vmatprep.mubr.msk.f32.mxu1 %vm241_vm2, %v635_v36 }
 0x487   :  { %3449 = vmatmul.mubr.msk.f32.vlgmr.msra.gmra.mrb[6].mxu1 %vm241_vm2, %v637_v37 }
 0x51d   :  { %v4224_v38 = vpop.f32.mrb[2].mxu1 }
 0x51e   :  { %v4226_v39 = vpop.f32.mrb[3].mxu1 }
 0x552   :  { %v4228_v40 = vpop.f32.mrb[4].mxu1 }
 0x553   :  { %v4230_v41 = vpop.f32.mrb[5].mxu1 }
 0x55a   :  { %v3450_v42 = vpop.f32.mrb[6].mxu1 }
 0x55b   :  { %v722_v43 = vadd.f32 %v3450_v42, %v4173_v34  ;;  %v716_v44 = vpop.f32.mrb[7].mxu1 }
 0x55c   :  { %v717_v45 = vadd.f32 %v716_v44, %v4178_v35 }
 0x55d   :  { %v728_v46 = vsel %vm39_vm0, %v722_v43, -inf }
 0x55e   :  { %729 = vmax.xlane.f32.xlu0 %v728_v46  ;;  %v725_v47 = vsel %vm39_vm0, %v717_v45, -inf }
 0x55f   :  { %726 = vmax.xlane.f32.xlu1 %v725_v47 }
 0x5eb   :  { %v730_v48 = vpop.xlane.xlu0 %729 }
 0x5ec   :  { %v732_v49 = vsub.f32 %v722_v43, %v730_v48  ;;  %v727_v50 = vpop.xlane.xlu1 %726 }
 0x5ed   :  { %v731_v51 = vsub.f32 %v717_v45, %v727_v50 }
 0x5ee   :  { %v735_v52 = vmul.f32 1.442695, %v732_v49 }
 0x5ef   :  { %v733_v53 = vmul.f32 1.442695, %v731_v51 }
 0x5f0   :  { %3985 = vpow2.f32 %v735_v52 }
 0x5f1   :  { %3987 = vpow2.f32 %v733_v53 }
 0x5fa   :  { %v3986_v54 = vpop.eup %3985 }
 0x5fb   :  { %v3988_v55 = vpop.eup %3987  ;;  %v740_v56 = vsel %vm39_vm0, %v3986_v54, 0.0 }
 0x5fc   :  { %741 = vadd.xlane.f32.xlu1 %v740_v56  ;;  %v737_v57 = vsel %vm39_vm0, %v3988_v55, 0.0 }
 0x5fd   :  { %738 = vadd.xlane.f32.xlu0 %v737_v57 }
 0x60d   :  { %3920 = vrot.lane.b32.xlu1 %v4144_v22, %s4058_s21 }
 0x611   :  { %834 = vrot.lane.b32.xlu1 %v4136_v21, %s4059_s22 }
 0x613   :  { %3915 = vrot.lane.b32.xlu0 %v4144_v22, %s4060_s23 }
 0x617   :  { %836 = vrot.lane.b32.xlu0 %v4134_v19, %s4059_s22 }
 0x689   :  { %v742_v58 = vpop.xlane.xlu1 %741 }
 0x68a   :  { %3989 = vrcp.f32 %v742_v58  ;;  %v739_v59 = vpop.xlane.xlu0 %738 }
 0x68b   :  { %3991 = vrcp.f32 %v739_v59  ;;  %v4320_v59 = vld [vmem:[%s4896_s1 + $0x30] sm:$0xff] }
 0x68d   :  { %v3921_v60 = vpop.permute.xlu1 %3920 }
 0x68e   :  { %v3916_v61 = vpop.permute.xlu0 %3915  ;;  %v3923_v62 = vunpack.i.h.bf16 %v3921_v60  ;;  %v3922_v63 = vunpack.i.l.bf16 %v3921_v60 }
 0x68f   :  { %v3918_v0 = vunpack.i.h.bf16 %v3916_v61  ;;  %v3917_v1 = vunpack.i.l.bf16 %v3916_v61 }
 0x690   :  { %v3712_v3 = vpack.c.bf16 %v3923_v62, %v3922_v63 }
 0x691   :  { %v3708_v2 = vpack.c.bf16 %v3918_v0, %v3917_v1  ;;  %v835_v6 = vpop.permute.xlu1 %834 }
 0x692   :  { %v837_v7 = vpop.permute.xlu0 %836 }
 0x693   :  { %3709 = vmatprep.subr.bf16.mxu0 %v3708_v2 }
 0x694   :  { %v3990_v21 = vpop.eup %3989  ;;  %3711 = vmatpush3.bf16.msra.mxu0 %v3708_v2 }
 0x695   :  { %v3992_v4 = vpop.eup %3991  ;;  %3714 = vmatprep.subr.msk.bf16.mxu0 %vm4154_vm3, %v3712_v3  ;;  %v4250_v5 = vmul.f32 %v3990_v21, %v3986_v54 }
 0x696   :  { %v4248_v19 = vmul.f32 %v3992_v4, %v3988_v55 }
 0x698   :  { %3455 = vmatprep.mubr.msk.f32.mxu0 %vm39_vm0, %v4248_v19 }
 0x699   :  { %3456 = vmatmul.mubr.msk.f32.vlgmr.msra.gmra.mrb[6].mxu0 %vm39_vm0, %v4250_v5 }
 0x69a   :  { %3462 = vmatprep.mubr.msk.f32.mxu0 %vm241_vm2, %v835_v6 }
 0x69d   :  { %3717 = vmatpush3.bf16.xpose.msk.msra.mxu0 %vm4154_vm3, %v3712_v3 }
 0x6a4   :  { %3463 = vmatmul.mubr.msk.f32.vlgmr.msra.gmra.mrb[8].mxu0 %vm241_vm2, %v837_v7 }
 0x76c   :  { %v4260_v8 = vpop.f32.mrb[6].mxu0 }
 0x76d   :  { %v4262_v9 = vpop.f32.mrb[7].mxu0 }
 0x777   :  { %v3464_v10 = vpop.f32.mrb[8].mxu0 }
 0x778   :  { %v922_v11 = vadd.f32 %v3464_v10, %v4173_v34  ;;  %v916_v12 = vpop.f32.mrb[9].mxu0 }
 0x779   :  { %v917_v17 = vadd.f32 %v916_v12, %v4178_v35  ;;  %v4344_v12 = vld [vmem:[%s4896_s1 + $0x40] sm:$0xff] }
 0x77a   :  { %v928_v18 = vsel %vm39_vm0, %v922_v11, -inf }
 0x77b   :  { %929 = vmax.xlane.f32.xlu0 %v928_v18  ;;  %v925_v20 = vsel %vm39_vm0, %v917_v17, -inf  ;;  %v4350_v18 = vld [vmem:[%s4896_s1 + $0x48] sm:$0xff] }
 0x77c   :  { %926 = vmax.xlane.f32.xlu1 %v925_v20 }
 0x808   :  { %v930_v23 = vpop.xlane.xlu0 %929 }
 0x809   :  { %v932_v24 = vsub.f32 %v922_v11, %v930_v23  ;;  %v927_v25 = vpop.xlane.xlu1 %926 }
 0x80a   :  { %v931_v27 = vsub.f32 %v917_v17, %v927_v25 }
 0x80b   :  { %v935_v28 = vmul.f32 1.442695, %v932_v24 }
 0x80c   :  { %v933_v29 = vmul.f32 1.442695, %v931_v27 }
 0x80d   :  { %3993 = vpow2.f32 %v935_v28 }
 0x80e   :  { %3995 = vpow2.f32 %v933_v29 }
 0x817   :  { %v3994_v30 = vpop.eup %3993 }
 0x818   :  { %v3996_v31 = vpop.eup %3995  ;;  %v940_v36 = vsel %vm39_vm0, %v3994_v30, 0.0 }
 0x819   :  { %941 = vadd.xlane.f32.xlu1 %v940_v36  ;;  %v937_v37 = vsel %vm39_vm0, %v3996_v31, 0.0 }
 0x81a   :  { %938 = vadd.xlane.f32.xlu0 %v937_v37 }
 0x82a   :  { %1042 = vrot.lane.b32.xlu1 %v4226_v39, %s4061_s24 }
 0x82e   :  { %1044 = vrot.lane.b32.xlu1 %v4224_v38, %s4061_s24 }
 0x830   :  { %3925 = vrot.lane.b32.xlu0 %v4144_v22, %s4062_s25 }
 0x832   :  { %1068 = vrot.lane.b32.xlu1 %v4224_v38, %s4063_s26 }
 0x834   :  { %1066 = vrot.lane.b32.xlu0 %v4226_v39, %s4063_s26 }
 0x836   :  { %1092 = vrot.lane.b32.xlu1 %v4224_v38, %s4064_s27 }
 0x838   :  { %1090 = vrot.lane.b32.xlu0 %v4226_v39, %s4064_s27 }
 0x83a   :  { %1048 = vrot.lane.b32.xlu1 %v4228_v40, %s4061_s24 }
 0x83c   :  { %1046 = vrot.lane.b32.xlu0 %v4230_v41, %s4061_s24 }
 0x83e   :  { %1072 = vrot.lane.b32.xlu1 %v4228_v40, %s4063_s26 }
 0x840   :  { %1070 = vrot.lane.b32.xlu0 %v4230_v41, %s4063_s26 }
 0x842   :  { %1096 = vrot.lane.b32.xlu1 %v4228_v40, %s4064_s27 }
 0x844   :  { %1094 = vrot.lane.b32.xlu0 %v4230_v41, %s4064_s27 }
 0x846   :  { %1052 = vrot.lane.b32.xlu1 %v4260_v8, %s4061_s24 }
 0x848   :  { %1050 = vrot.lane.b32.xlu0 %v4262_v9, %s4061_s24 }
 0x84a   :  { %1076 = vrot.lane.b32.xlu1 %v4260_v8, %s4063_s26 }
 0x84c   :  { %1074 = vrot.lane.b32.xlu0 %v4262_v9, %s4063_s26 }
 0x84e   :  { %1100 = vrot.lane.b32.xlu1 %v4260_v8, %s4064_s27 }
 0x850   :  { %1098 = vrot.lane.b32.xlu0 %v4262_v9, %s4064_s27 }
 0x8a6   :  { %v942_v22 = vpop.xlane.xlu1 %941 }
 0x8a7   :  { %3997 = vrcp.f32 %v942_v22  ;;  %v939_v42 = vpop.xlane.xlu0 %938 }
 0x8a8   :  { %3999 = vrcp.f32 %v939_v42  ;;  %v4364_v42 = vld [vmem:[%s4896_s1 + $0x50] sm:$0xff] }
 0x8aa   :  { %v1043_v43 = vpop.permute.xlu1 %1042 }
 0x8ab   :  { %v3926_v44 = vpop.permute.xlu0 %3925  ;;  %v1114_v53 = vsel %vm241_vm2, %v4226_v39, %v1043_v43  ;;  %v4328_v39 = vld [vmem:[%s4896_s1 + $0x38] sm:$0xff] }
 0x8ac   :  { %v3928_v45 = vunpack.i.h.bf16 %v3926_v44  ;;  %v3927_v46 = vunpack.i.l.bf16 %v3926_v44  ;;  %v4370_v44 = vld [vmem:[%s4896_s1 + $0x58] sm:$0xff] }
 0x8ae   :  { %v1045_v47 = vpop.permute.xlu1 %1044  ;;  %v3718_v48 = vpack.c.bf16 %v3928_v45, %v3927_v46 }
 0x8af   :  { %v1067_v49 = vpop.permute.xlu0 %1066  ;;  %v1115_v58 = vsel %vm241_vm2, %v4224_v38, %v1045_v47 }
 0x8b0   :  { %3719 = vmatprep.subr.bf16.mxu1 %v3718_v48  ;;  %v1122_v56 = vsel %vm39_vm0, %v1114_v53, %v1067_v49  ;;  %v126_v53 = vld [vmem:[%s4896_s1 + $0xc8] sm:$0xff] }
 0x8b1   :  { %v3998_v50 = vpop.eup %3997  ;;  %3721 = vmatpush3.bf16.msra.mxu1 %v3718_v48 }
 0x8b2   :  { %v4000_v51 = vpop.eup %3999  ;;  %v1069_v52 = vpop.permute.xlu1 %1068  ;;  %v4313_v57 = vmul.f32 %v3998_v50, %v3994_v30 }
 0x8b3   :  { %v1091_v54 = vpop.permute.xlu0 %1090  ;;  %v4310_v55 = vmul.f32 %v4000_v51, %v3996_v31  ;;  %v1123_v61 = vsel %vm39_vm0, %v1115_v58, %v1069_v52  ;;  %v4381_v51 = vld [vmem:[%s4896_s1 + $0x20] sm:$0xff]  ;;  %v128_v58 = vld [vmem:[%s4896_s1 + $0xd8] sm:$0xff] }
 0x8b4   :  { %v1131_v60 = vsel %vm1130_vm4, %v1122_v56, %v1091_v54  ;;  %v125_v52 = vld [vmem:[%s4896_s1 + $0xc0] sm:$0xff]  ;;  %v127_v54 = vld [vmem:[%s4896_s1 + $0xd0] sm:$0xff] }
 0x8b5   :  { %3469 = vmatprep.mubr.msk.f32.mxu1 %vm39_vm0, %v4310_v55  ;;  %v1139_v0 = vmul.f32 %v1131_v60, %v4320_v59  ;;  %v3738_v56 = vpack.c.bf16 %v126_v53, %v125_v52  ;;  %v3742_v60 = vpack.c.bf16 %v128_v58, %v127_v54  ;;  %v130_v52 = vld [vmem:[%s4896_s1 + $0xe8] sm:$0xff]  ;;  %v131_v54 = vld [vmem:[%s4896_s1 + $0xf0] sm:$0xff] }
 0x8b6   :  { %3470 = vmatmul.mubr.msk.f32.vlgmr.msra.gmra.mrb[8].mxu1 %vm39_vm0, %v4313_v57  ;;  %v1093_v38 = vpop.permute.xlu1 %1092 }
 0x8b7   :  { %v1132_v62 = vsel %vm1130_vm4, %v1123_v61, %v1093_v38  ;;  %v1047_v63 = vpop.permute.xlu0 %1046  ;;  %3488 = vmatprep.mubr.msk.f32.mxu1 %vm1147_vm5, %v4381_v51  ;;  %3739 = vmatprep.subr.bf16.mxu0 %v3738_v56 }
 0x8b8   :  { %v1140_v1 = vmul.f32 %v1132_v62, %v4328_v39  ;;  %v1116_v6 = vsel %vm241_vm2, %v4230_v41, %v1047_v63  ;;  %3741 = vmatpush3.bf16.msra.mxu0 %v3738_v56  ;;  %v132_v56 = vld [vmem:[%s4896_s1 + $0xf8] sm:$0xff] }
 0x8b9   :  { %3743 = vmatprep.subr.bf16.mxu0 %v3742_v60  ;;  %v3750_v58 = vpack.c.bf16 %v132_v56, %v131_v54 }
 0x8ba   :  { %v1049_v2 = vpop.permute.xlu1 %1048  ;;  %v3722_v3 = vpack.c.bf16 %v1140_v1, %v1139_v0  ;;  %v4405_v1 = vld [vmem:[%s4896_s1 + $0x68] sm:$0xff] }
 0x8bb   :  { %v1071_v21 = vpop.permute.xlu0 %1070  ;;  %v1117_v11 = vsel %vm241_vm2, %v4228_v40, %v1049_v2 }
 0x8bc   :  { %3723 = vmatprep.subr.bf16.mxu1 %v3722_v3  ;;  %v1124_v10 = vsel %vm39_vm0, %v1116_v6, %v1071_v21  ;;  %3745 = vmatpush3.bf16.msra.mxu0 %v3742_v60  ;;  %v133_v60 = vld [vmem:[%s4896_s1 + $0x100] sm:$0xff] }
 0x8bd   :  { %3725 = vmatpush3.bf16.msra.mxu1 %v3722_v3 }
 0x8be   :  { %v1073_v4 = vpop.permute.xlu1 %1072 }
 0x8bf   :  { %v1095_v7 = vpop.permute.xlu0 %1094  ;;  %v1125_v41 = vsel %vm39_vm0, %v1117_v11, %v1073_v4  ;;  %v4412_v4 = vld [vmem:[%s4896_s1 + $0x60] sm:$0xff] }
 0x8c0   :  { %v1133_v17 = vsel %vm1130_vm4, %v1124_v10, %v1095_v7 }
 0x8c1   :  { %v1141_v40 = vmul.f32 %v1133_v17, %v4344_v12 }
 0x8c2   :  { %v1097_v20 = vpop.permute.xlu1 %1096 }
 0x8c3   :  { %v1134_v23 = vsel %vm1130_vm4, %v1125_v41, %v1097_v20  ;;  %v1051_v24 = vpop.permute.xlu0 %1050 }
 0x8c4   :  { %v1142_v25 = vmul.f32 %v1134_v23, %v4350_v18  ;;  %v1118_v31 = vsel %vm241_vm2, %v4262_v9, %v1051_v24  ;;  %v4422_v23 = vld [vmem:[%s4896_s1 + $0x28] sm:$0xff] }
 0x8c6   :  { %v1053_v27 = vpop.permute.xlu1 %1052  ;;  %v3726_v28 = vpack.c.bf16 %v1142_v25, %v1141_v40  ;;  %v3190_v25 = vld [vmem:[%s4898_s2 + $0x1] ss:$0 sm:$0xff] }
 0x8c7   :  { %v1075_v29 = vpop.permute.xlu0 %1074  ;;  %v1119_v22 = vsel %vm241_vm2, %v4260_v8, %v1053_v27 }
 0x8c8   :  { %3727 = vmatprep.subr.bf16.mxu1 %v3726_v28  ;;  %v1126_v37 = vsel %vm39_vm0, %v1118_v31, %v1075_v29 }
 0x8c9   :  { %3729 = vmatpush3.bf16.msra.mxu1 %v3726_v28 }
 0x8ca   :  { %v1077_v30 = vpop.permute.xlu1 %1076 }
 0x8cb   :  { %v1099_v36 = vpop.permute.xlu0 %1098  ;;  %v1127_v9 = vsel %vm39_vm0, %v1119_v22, %v1077_v30 }
 0x8cc   :  { %v1135_v43 = vsel %vm1130_vm4, %v1126_v37, %v1099_v36 }
 0x8cd   :  { %v1143_v47 = vmul.f32 %v1135_v43, %v4364_v42 }
 0x8ce   :  { %v1101_v45 = vpop.permute.xlu1 %1100 }
 0x8cf   :  { %v1136_v46 = vsel %vm1130_vm4, %v1127_v9, %v1101_v45 }
 0x8d0   :  { %v1144_v8 = vmul.f32 %v1136_v46, %v4370_v44 }
 0x8d2   :  { %v3730_v48 = vpack.c.bf16 %v1144_v8, %v1143_v47 }
 0x8d4   :  { %3731 = vmatprep.subr.bf16.mxu1 %v3730_v48 }
 0x8d5   :  { %3733 = vmatpush3.bf16.msra.mxu1 %v3730_v48 }
 0x989   :  { %v3471_v49 = vpop.f32.mrb[8].mxu1 }
 0x98a   :  { %1056 = vrot.lane.b32.xlu1 %v3471_v49, %s4061_s24  ;;  %v1025_v50 = vpop.f32.mrb[9].mxu1 }
 0x98b   :  { %1054 = vrot.lane.b32.xlu0 %v1025_v50, %s4061_s24 }
 0x98e   :  { %1080 = vrot.lane.b32.xlu1 %v3471_v49, %s4063_s26 }
 0x98f   :  { %1078 = vrot.lane.b32.xlu0 %v1025_v50, %s4063_s26 }
 0x992   :  { %1104 = vrot.lane.b32.xlu1 %v3471_v49, %s4064_s27 }
 0x993   :  { %1102 = vrot.lane.b32.xlu0 %v1025_v50, %s4064_s27 }
 0x9fc   :  { %v1057_v61 = vpop.permute.xlu1 %1056 }
 0x9fd   :  { %v1055_v38 = vpop.permute.xlu0 %1054  ;;  %v1121_v0 = vsel %vm241_vm2, %v3471_v49, %v1057_v61  ;;  %v134_v61 = vld [vmem:[%s4896_s1 + $0x108] sm:$0xff] }
 0x9fe   :  { %v1120_v2 = vsel %vm241_vm2, %v1025_v50, %v1055_v38  ;;  %v135_v38 = vld [vmem:[%s4896_s1 + $0x110] sm:$0xff] }
 0xa00   :  { %v1081_v62 = vpop.permute.xlu1 %1080 }
 0xa01   :  { %v1079_v63 = vpop.permute.xlu0 %1078  ;;  %v1129_v3 = vsel %vm39_vm0, %v1121_v0, %v1081_v62  ;;  %v3754_v62 = vpack.c.bf16 %v134_v61, %v133_v60 }
 0xa02   :  { %v1128_v6 = vsel %vm39_vm0, %v1120_v2, %v1079_v63  ;;  %v136_v63 = vld [vmem:[%s4896_s1 + $0x118] sm:$0xff]  ;;  %v137_v2 = vld [vmem:[%s4896_s1 + $0x120] sm:$0xff] }
 0xa03   :  { %v3758_v0 = vpack.c.bf16 %v136_v63, %v135_v38 }
 0xa04   :  { %v1105_v21 = vpop.permute.xlu1 %1104 }
 0xa05   :  { %v1138_v7 = vsel %vm1130_vm4, %v1129_v3, %v1105_v21  ;;  %v1103_v10 = vpop.permute.xlu0 %1102  ;;  %v138_v3 = vld [vmem:[%s4896_s1 + $0x128] sm:$0xff] }
 0xa06   :  { %v1146_v11 = vmul.f32 %v1138_v7, %v4405_v1  ;;  %v1137_v17 = vsel %vm1130_vm4, %v1128_v6, %v1103_v10  ;;  %v3762_v21 = vpack.c.bf16 %v138_v3, %v137_v2 }
 0xa07   :  { %v1145_v41 = vmul.f32 %v1137_v17, %v4412_v4 }
 0xa09   :  { %v3734_v20 = vpack.c.bf16 %v1146_v11, %v1145_v41 }
 0xa0b   :  { %3735 = vmatprep.subr.bf16.mxu1 %v3734_v20 }
 0xa0c   :  { %3737 = vmatpush3.bf16.msra.mxu1 %v3734_v20 }
 0xa0d   :  { %3755 = vmatprep.subr.bf16.mxu1 %v3754_v62 }
 0xa0f   :  { %3489 = vmatmul.mubr.msk.f32.vlgmr.msra.gmra.mrb[10].mxu1 %vm1147_vm5, %v4422_v23 }
 0xa10   :  { %3757 = vmatpush3.bf16.msra.mxu1 %v3754_v62 }
 0xa11   :  { %3759 = vmatprep.subr.bf16.mxu1 %v3758_v0 }
 0xa14   :  { %3761 = vmatpush3.bf16.msra.mxu1 %v3758_v0 }
 0xa15   :  { %3763 = vmatprep.subr.bf16.mxu1 %v3762_v21 }
 0xa18   :  { %3765 = vmatpush3.bf16.msra.mxu1 %v3762_v21 }
 0xae2   :  { %v3490_v24 = vpop.f32.mrb[10].mxu1 }
 0xae3   :  { %v1220_v40 = vpop.f32.mrb[11].mxu1 }
 0xae4   :  { %3499 = vmatprep.mubr.msk.f32.mxu0 %vm153_vm1, %v1220_v40 }
 0xae5   :  { %3500 = vmatmul.mubr.msk.f32.vlgmr.msra.gmra.mrb[10].mxu0 %vm153_vm1, %v3490_v24  ;;  %v3193_v24 = vld [vmem:[%s4898_s2 + $0x4] ss:$0 sm:$0xff] }
 0xbb8   :  { %v3501_v27 = vpop.f32.mrb[10].mxu0 }
 0xbb9   :  { %v1311_v28 = vadd.f32 %v3501_v27, %v3190_v25  ;;  %v1305_v29 = vpop.f32.mrb[11].mxu0 }
 0xbba   :  { %v1306_v30 = vadd.f32 %v3190_v25, %v1305_v29  ;;  %v3194_v25 = vld [vmem:[%s4898_s2 + $0x5] ss:$0 sm:$0xff] }
 0xbbb   :  { %v1315_v31 = vadd.f32 %v1311_v28, %v4125_v16 }
 0xbbc   :  { %v1314_v36 = vadd.f32 %v1306_v30, %v4123_v15  ;;  %v129_v15 = vld [vmem:[%s4896_s1 + $0xe0] sm:$0xff] }
 0xbbd   :  { %v1319_v37 = vsel %vm153_vm1, %v1315_v31, 0.0  ;;  %v3746_v53 = vpack.c.bf16 %v130_v52, %v129_v15 }
 0xbbe   :  { %1320 = vadd.xlane.f32.xlu1 %v1319_v37  ;;  %v1316_v22 = vsel %vm153_vm1, %v1314_v36, 0.0  ;;  %v139_v37 = vld [vmem:[%s4896_s1 + $0x130] sm:$0xff] }
 0xbbf   :  { %1317 = vadd.xlane.f32.xlu0 %v1316_v22  ;;  %3747 = vmatprep.subr.bf16.mxu0 %v3746_v53  ;;  %v140_v22 = vld [vmem:[%s4896_s1 + $0x138] sm:$0xff] }
 0xbc0   :  { %3749 = vmatpush3.bf16.msra.mxu0 %v3746_v53 }
 0xbc1   :  { %3751 = vmatprep.subr.bf16.mxu0 %v3750_v58 }
 0xbc4   :  { %3753 = vmatpush3.bf16.msra.mxu0 %v3750_v58 }
 0xc4b   :  { %v1321_v43 = vpop.xlane.xlu1 %1320 }
 0xc4c   :  { %v1324_v9 = vmul.f32 0.03125, %v1321_v43  ;;  %v1318_v45 = vpop.xlane.xlu0 %1317  ;;  %v3766_v43 = vpack.c.bf16 %v140_v22, %v139_v37 }
 0xc4d   :  { %v1323_v46 = vmul.f32 0.03125, %v1318_v45 }
 0xc4e   :  { %v1326_v47 = vsub.f32 %v1315_v31, %v1324_v9  ;;  %3767 = vmatprep.subr.bf16.mxu1 %v3766_v43  ;;  %v3195_v9 = vld [vmem:[%s4898_s2 + $0x2] ss:$0 sm:$0xff] }
 0xc4f   :  { %v1325_v8 = vsub.f32 %v1314_v36, %v1323_v46  ;;  %3769 = vmatpush3.bf16.msra.mxu1 %v3766_v43 }
 0xc50   :  { %v1328_v50 = vmul.f32 %v1326_v47, %v1326_v47 }
 0xc51   :  { %v1327_v48 = vmul.f32 %v1325_v8, %v1325_v8 }
 0xc52   :  { %v1332_v16 = vsel %vm153_vm1, %v1328_v50, 0.0  ;;  %v3198_v50 = vld [vmem:[%s4898_s2 + $0x3] ss:$0 sm:$0xff] }
 0xc53   :  { %v1329_v49 = vsel %vm153_vm1, %v1327_v48, 0.0 }
 0xc54   :  { %1330 = vadd.xlane.f32.xlu0 %v1329_v49 }
 0xc58   :  { %1333 = vadd.xlane.f32.xlu0 %v1332_v16 }
 0xce1   :  { %v1331_v6 = vpop.xlane.xlu0 %1330 }
 0xce2   :  { %v1335_v7 = vmul.f32 0.03125, %v1331_v6 }
 0xce4   :  { %v1337_v10 = vadd.f32 1e-09, %v1335_v7 }
 0xce5   :  { %v1334_v11 = vpop.xlane.xlu0 %1333 }
 0xce6   :  { %4001 = vrsqrt.f32 %v1337_v10  ;;  %v1336_v17 = vmul.f32 0.03125, %v1334_v11  ;;  %v1567_v10 = vld [vmem:[%s4896_s1 + $0x140] sm:$0xff]  ;;  %v1568_v11 = vld [vmem:[%s4896_s1 + $0x148] sm:$0xff] }
 0xce8   :  { %v1338_v41 = vadd.f32 1e-09, %v1336_v17  ;;  %v3770_v17 = vpack.c.bf16 %v1568_v11, %v1567_v10 }
 0xcea   :  { %4003 = vrsqrt.f32 %v1338_v41  ;;  %v1569_v41 = vld [vmem:[%s4896_s1 + $0x150] sm:$0xff]  ;;  %3771 = vmatprep.subr.bf16.mxu0 %v3770_v17 }
 0xcf0   :  { %v4002_v20 = vpop.eup %4001 }
 0xcf1   :  { %v1341_v40 = vmul.f32 %v4002_v20, %v1325_v8  ;;  %v1570_v20 = vld [vmem:[%s4896_s1 + $0x158] sm:$0xff] }
 0xcf3   :  { %v1347_v27 = vmul.f32 %v3193_v24, %v1341_v40 }
 0xcf4   :  { %v4004_v28 = vpop.eup %4003 }
 0xcf5   :  { %v1342_v29 = vmul.f32 %v4004_v28, %v1326_v47  ;;  %v1353_v30 = vadd.f32 %v3194_v25, %v1347_v27 }
 0xcf7   :  { %v1348_v31 = vmul.f32 %v3193_v24, %v1342_v29  ;;  %3510 = vmatprep.mubr.msk.f32.mxu0 %vm153_vm1, %v1353_v30  ;;  %v3774_v24 = vpack.c.bf16 %v1570_v20, %v1569_v41 }
 0xcf9   :  { %v1354_v36 = vadd.f32 %v3194_v25, %v1348_v31 }
 0xcfb   :  { %3511 = vmatmul.mubr.msk.f32.vlgmr.msra.gmra.mrb[12].mxu0 %vm153_vm1, %v1354_v36 }
 0xcfc   :  { %3773 = vmatpush3.bf16.msra.mxu0 %v3770_v17 }
 0xcfd   :  { %3775 = vmatprep.subr.bf16.mxu0 %v3774_v24 }
 0xd00   :  { %3777 = vmatpush3.bf16.msra.mxu0 %v3774_v24 }
 0xdce   :  { %v3512_v45 = vpop.f32.mrb[12].mxu0 }
 0xdcf   :  { %v1437_v46 = vadd.f32 %v3512_v45, %v3195_v9  ;;  %v1431_v47 = vpop.f32.mrb[13].mxu0 }
 0xdd0   :  { %v1432_v8 = vadd.f32 %v3195_v9, %v1431_v47  ;;  %v3202_v9 = vld [vmem:[%s4898_s2 + $0x7] ss:$0 sm:$0xff] }
 0xdd1   :  { %v1441_v49 = vmax.f32 %v1437_v46, 0.0 }
 0xdd2   :  { %v1440_v48 = vmax.f32 %v1432_v8, 0.0 }
 0xdd4   :  { %3529 = vmatprep.mubr.msk.f32.mxu1 %vm1147_vm5, %v1440_v48  ;;  %v3203_v48 = vld [vmem:[%s4898_s2 + $0x8] ss:$0 sm:$0xff] }
 0xdd5   :  { %3530 = vmatmul.mubr.msk.f32.vlgmr.msra.gmra.mrb[12].mxu1 %vm1147_vm5, %v1441_v49 }
 0xea8   :  { %v3531_v16 = vpop.f32.mrb[12].mxu1 }
 0xea9   :  { %v1524_v15 = vadd.f32 %v3531_v16, %v3198_v50  ;;  %v1518_v52 = vpop.f32.mrb[13].mxu1 }
 0xeaa   :  { %v1519_v53 = vadd.f32 %v3198_v50, %v1518_v52 }
 0xeab   :  { %v1528_v54 = vadd.f32 %v1524_v15, %v1354_v36  ;;  %v3201_v36 = vld [vmem:[%s4898_s2 + $0x6] ss:$0 sm:$0xff] }
 0xeac   :  { %v1527_v56 = vadd.f32 %v1519_v53, %v1353_v30 }
 0xead   :  { %v1532_v58 = vsel %vm153_vm1, %v1528_v54, 0.0 }
 0xeae   :  { %1533 = vadd.xlane.f32.xlu0 %v1532_v58  ;;  %v1529_v60 = vsel %vm153_vm1, %v1527_v56, 0.0 }
 0xeaf   :  { %1530 = vadd.xlane.f32.xlu1 %v1529_v60 }
 0xf3b   :  { %v1534_v61 = vpop.xlane.xlu0 %1533 }
 0xf3c   :  { %v1536_v38 = vmul.f32 0.03125, %v1534_v61  ;;  %v1531_v62 = vpop.xlane.xlu1 %1530 }
 0xf3d   :  { %v1535_v63 = vmul.f32 0.03125, %v1531_v62 }
 0xf3e   :  { %v1538_v0 = vsub.f32 %v1528_v54, %v1536_v38 }
 0xf3f   :  { %v1537_v2 = vsub.f32 %v1527_v56, %v1535_v63 }
 0xf40   :  { %v1540_v3 = vmul.f32 %v1538_v0, %v1538_v0 }
 0xf41   :  { %v1539_v21 = vmul.f32 %v1537_v2, %v1537_v2 }
 0xf42   :  { %v1544_v6 = vsel %vm153_vm1, %v1540_v3, 0.0 }
 0xf43   :  { %1545 = vadd.xlane.f32.xlu0 %v1544_v6  ;;  %v1541_v7 = vsel %vm153_vm1, %v1539_v21, 0.0 }
 0xf44   :  { %1542 = vadd.xlane.f32.xlu1 %v1541_v7 }
 0xfd0   :  { %v1546_v40 = vpop.xlane.xlu0 %1545 }
 0xfd1   :  { %v1548_v25 = vmul.f32 0.03125, %v1546_v40  ;;  %v1543_v27 = vpop.xlane.xlu1 %1542 }
 0xfd2   :  { %v1547_v28 = vmul.f32 0.03125, %v1543_v27 }
 0xfd3   :  { %v1550_v29 = vadd.f32 1e-09, %v1548_v25 }
 0xfd4   :  { %v1549_v30 = vadd.f32 1e-09, %v1547_v28 }
 0xfd5   :  { %4005 = vrsqrt.f32 %v1550_v29 }
 0xfd6   :  { %4007 = vrsqrt.f32 %v1549_v30 }
 0xfdf   :  { %v4006_v31 = vpop.eup %4005 }
 0xfe0   :  { %v4008_v37 = vpop.eup %4007  ;;  %v1554_v22 = vmul.f32 %v4006_v31, %v1538_v0 }
 0xfe1   :  { %v1553_v43 = vmul.f32 %v4008_v37, %v1537_v2 }
 0xfe2   :  { %v1560_v45 = vmul.f32 %v3201_v36, %v1554_v22 }
 0xfe3   :  { %v1559_v46 = vmul.f32 %v3201_v36, %v1553_v43 }
 0xfe4   :  { %v4513_v8 = vadd.f32 %v3202_v9, %v1560_v45 }
 0xfe5   :  { %v4511_v47 = vadd.f32 %v3202_v9, %v1559_v46 }
 0xfe7   :  { %3540 = vmatprep.mubr.msk.f32.mxu0 %vm153_vm1, %v4511_v47 }
 0xfe8   :  { %3541 = vmatmul.mubr.msk.f32.vlgmr.msra.gmra.mrb[14].mxu0 %vm153_vm1, %v4513_v8 }
0x10bb   :  { %v3542_v49 = vpop.f32.mrb[14].mxu0 }
0x10bc   :  { %v4522_v50 = vadd.f32 %v3542_v49, %v3203_v48  ;;  %v1671_v16 = vpop.f32.mrb[15].mxu0 }
0x10bd   :  { %v4524_v15 = vadd.f32 %v3203_v48, %v1671_v16 }
0x10bf   :  { %3547 = vmatprep.mubr.msk.f32.mxu0 %vm241_vm2, %v4524_v15  ;;  %v4530_v52 = vpack.i.bf16 %v4522_v50, %v4524_v15 }
0x10c1   :  { %3935 = vrot.lane.b32.xlu0 %v4530_v52, %s4053_s12  ;;  %3930 = vrot.lane.b32.xlu1 %v4530_v52, %s4052_s11 }
0x10c5   :  { %1878 = vrot.lane.b32.xlu1 %v4524_v15, %s4051_s10 }
0x10c9   :  { %1880 = vrot.lane.b32.xlu1 %v4522_v50, %s4051_s10 }
0x1133   :  { %v3936_v53 = vpop.permute.xlu0 %3935  ;;  %v3931_v54 = vpop.permute.xlu1 %3930 }
0x1134   :  { %v3938_v56 = vunpack.i.h.bf16 %v3936_v53  ;;  %v3937_v58 = vunpack.i.l.bf16 %v3936_v53  ;;  %v3933_v60 = vunpack.i.h.bf16 %v3931_v54  ;;  %v3932_v61 = vunpack.i.l.bf16 %v3931_v54 }
0x1136   :  { %v3778_v38 = vpack.c.bf16 %v3933_v60, %v3932_v61  ;;  %v3788_v62 = vpack.c.bf16 %v3938_v56, %v3937_v58 }
0x1137   :  { %v1879_v63 = vpop.permute.xlu1 %1878 }
0x1138   :  { %3780 = vmatprep.subr.msk.bf16.mxu0 %vm4154_vm3, %v3778_v38 }
0x1139   :  { %3783 = vmatpush3.bf16.xpose.msk.msra.mxu0 %vm4154_vm3, %v3778_v38 }
0x113a   :  { %3790 = vmatprep.subr.msk.bf16.mxu0 %vm4154_vm3, %v3788_v62 }
0x113b   :  { %v1881_v0 = vpop.permute.xlu1 %1880 }
0x1140   :  { %3548 = vmatmul.mubr.msk.f32.vlgmr.msra.gmra.mrb[16].mxu0 %vm241_vm2, %v4522_v50 }
0x1141   :  { %3793 = vmatpush3.bf16.xpose.msk.msra.mxu0 %vm4154_vm3, %v3788_v62  ;;  %3561 = vmatprep.mubr.msk.f32.mxu0 %vm241_vm2, %v1879_v63 }
0x1148   :  { %3562 = vmatmul.mubr.msk.f32.vlgmr.msra.gmra.mrb[18].mxu0 %vm241_vm2, %v1881_v0 }
0x1213   :  { %v3549_v2 = vpop.f32.mrb[16].mxu0 }
0x1214   :  { %v1766_v3 = vadd.f32 %v3549_v2, %v4173_v34  ;;  %v1760_v21 = vpop.f32.mrb[17].mxu0 }
0x1215   :  { %v1761_v6 = vadd.f32 %v1760_v21, %v4178_v35 }
0x1216   :  { %v1772_v7 = vsel %vm39_vm0, %v1766_v3, -inf }
0x1217   :  { %1773 = vmax.xlane.f32.xlu1 %v1772_v7  ;;  %v1769_v10 = vsel %vm39_vm0, %v1761_v6, -inf }
0x1218   :  { %1770 = vmax.xlane.f32.xlu0 %v1769_v10 }
0x121b   :  { %v3563_v11 = vpop.f32.mrb[18].mxu0 }
0x121c   :  { %v1960_v17 = vpop.f32.mrb[19].mxu0  ;;  %v1966_v20 = vadd.f32 %v3563_v11, %v4173_v34 }
0x121d   :  { %v1961_v41 = vadd.f32 %v1960_v17, %v4178_v35 }
0x121e   :  { %v1972_v40 = vsel %vm39_vm0, %v1966_v20, -inf }
0x121f   :  { %v1969_v24 = vsel %vm39_vm0, %v1961_v41, -inf }
0x1220   :  { %1970 = vmax.xlane.f32.xlu0 %v1969_v24 }
0x1224   :  { %1973 = vmax.xlane.f32.xlu0 %v1972_v40 }
0x1228   :  { %3940 = vrot.lane.b32.xlu1 %v4530_v52, %s4054_s17 }
0x12a4   :  { %v1774_v25 = vpop.xlane.xlu1 %1773 }
0x12a5   :  { %v1776_v27 = vsub.f32 %v1766_v3, %v1774_v25  ;;  %v1771_v28 = vpop.xlane.xlu0 %1770 }
0x12a6   :  { %v1775_v29 = vsub.f32 %v1761_v6, %v1771_v28 }
0x12a7   :  { %v1779_v30 = vmul.f32 1.442695, %v1776_v27 }
0x12a8   :  { %v1777_v31 = vmul.f32 1.442695, %v1775_v29  ;;  %v3941_v36 = vpop.permute.xlu1 %3940 }
0x12a9   :  { %4009 = vpow2.f32 %v1779_v30  ;;  %v3943_v35 = vunpack.i.h.bf16 %v3941_v36  ;;  %v3942_v37 = vunpack.i.l.bf16 %v3941_v36 }
0x12aa   :  { %4011 = vpow2.f32 %v1777_v31 }
0x12ab   :  { %v3784_v34 = vpack.c.bf16 %v3943_v35, %v3942_v37 }
0x12ad   :  { %3785 = vmatprep.subr.bf16.mxu1 %v3784_v34  ;;  %v1971_v22 = vpop.xlane.xlu0 %1970 }
0x12ae   :  { %3787 = vmatpush3.bf16.msra.mxu1 %v3784_v34  ;;  %v1975_v56 = vsub.f32 %v1961_v41, %v1971_v22 }
0x12b0   :  { %v1977_v58 = vmul.f32 1.442695, %v1975_v56 }
0x12b1   :  { %v1974_v43 = vpop.xlane.xlu0 %1973 }
0x12b2   :  { %v1976_v9 = vsub.f32 %v1966_v20, %v1974_v43  ;;  %v4049_v43 = vld [vmem:[%s4896_s1 + $0x78] sm:$0xff] }
0x12b3   :  { %v4010_v45 = vpop.eup %4009 }
0x12b4   :  { %v4012_v46 = vpop.eup %4011  ;;  %v1979_v48 = vmul.f32 1.442695, %v1976_v9  ;;  %v1784_v49 = vsel %vm39_vm0, %v4010_v45, 0.0 }
0x12b5   :  { %1785 = vadd.xlane.f32.xlu0 %v1784_v49  ;;  %v1781_v16 = vsel %vm39_vm0, %v4012_v46, 0.0 }
0x12b6   :  { %4013 = vpow2.f32 %v1979_v48  ;;  %1782 = vadd.xlane.f32.xlu1 %v1781_v16 }
0x12b7   :  { %4015 = vpow2.f32 %v1977_v58 }
0x12c0   :  { %v4014_v53 = vpop.eup %4013 }
0x12c1   :  { %v1984_v54 = vsel %vm39_vm0, %v4014_v53, 0.0  ;;  %v4016_v60 = vpop.eup %4015 }
0x12c2   :  { %1985 = vadd.xlane.f32.xlu0 %v1984_v54  ;;  %v1981_v61 = vsel %vm39_vm0, %v4016_v60, 0.0 }
0x12c7   :  { %3950 = vrot.lane.b32.xlu1 %v4530_v52, %s4055_s18 }
0x12d8   :  { %3945 = vrot.lane.b32.xlu0 %v4530_v52, %s4056_s19 }
0x12dc   :  { %2080 = vrot.lane.b32.xlu0 %v4522_v50, %s4057_s20 }
0x12eb   :  { %1982 = vadd.xlane.f32.xlu1 %v1981_v61 }
0x12fc   :  { %2078 = vrot.lane.b32.xlu1 %v4524_v15, %s4057_s20 }
0x1342   :  { %v1786_v38 = vpop.xlane.xlu0 %1785 }
0x1343   :  { %4017 = vrcp.f32 %v1786_v38  ;;  %v1783_v62 = vpop.xlane.xlu1 %1782 }
0x1344   :  { %4019 = vrcp.f32 %v1783_v62 }
0x1347   :  { %v3951_v6 = vpop.permute.xlu1 %3950 }
0x1348   :  { %v3953_v10 = vunpack.i.h.bf16 %v3951_v6  ;;  %v3952_v11 = vunpack.i.l.bf16 %v3951_v6 }
0x134a   :  { %v3798_v24 = vpack.c.bf16 %v3953_v10, %v3952_v11 }
0x134d   :  { %v4018_v63 = vpop.eup %4017 }
0x134e   :  { %v4020_v0 = vpop.eup %4019  ;;  %v4576_v21 = vmul.f32 %v4018_v63, %v4010_v45 }
0x134f   :  { %v1986_v2 = vpop.xlane.xlu0 %1985  ;;  %v4574_v3 = vmul.f32 %v4020_v0, %v4012_v46  ;;  %v4050_v46 = vld [vmem:[%s4896_s1 + $0x70] sm:$0xff] }
0x1350   :  { %4021 = vrcp.f32 %v1986_v2 }
0x1351   :  { %3554 = vmatprep.mubr.msk.f32.mxu1 %vm39_vm0, %v4574_v3 }
0x1352   :  { %3555 = vmatmul.mubr.msk.f32.vlgmr.msra.gmra.mrb[14].mxu1 %vm39_vm0, %v4576_v21 }
0x1353   :  { %v3946_v7 = vpop.permute.xlu0 %3945 }
0x1354   :  { %v3948_v17 = vunpack.i.h.bf16 %v3946_v7  ;;  %v3947_v41 = vunpack.i.l.bf16 %v3946_v7 }
0x1356   :  { %v3794_v20 = vpack.c.bf16 %v3948_v17, %v3947_v41 }
0x1357   :  { %v2081_v31 = vpop.permute.xlu0 %2080 }
0x1358   :  { %3795 = vmatprep.subr.bf16.mxu1 %v3794_v20 }
0x1359   :  { %3797 = vmatpush3.bf16.msra.mxu1 %v3794_v20 }
0x135a   :  { %3800 = vmatprep.subr.msk.bf16.mxu1 %vm4154_vm3, %v3798_v24  ;;  %v4022_v25 = vpop.eup %4021 }
0x135b   :  { %v4586_v29 = vmul.f32 %v4022_v25, %v4014_v53 }
0x1378   :  { %v1983_v40 = vpop.xlane.xlu1 %1982 }
0x1379   :  { %4023 = vrcp.f32 %v1983_v40 }
0x137c   :  { %v2079_v30 = vpop.permute.xlu1 %2078 }
0x1383   :  { %v4024_v27 = vpop.eup %4023 }
0x1384   :  { %v4584_v28 = vmul.f32 %v4024_v27, %v4016_v60 }
0x1386   :  { %3568 = vmatprep.mubr.msk.f32.mxu1 %vm39_vm0, %v4584_v28 }
0x1387   :  { %3569 = vmatmul.mubr.msk.f32.vlgmr.msra.gmra.mrb[16].mxu1 %vm39_vm0, %v4586_v29 }
0x1388   :  { %3803 = vmatpush3.bf16.xpose.msk.msra.mxu1 %vm4154_vm3, %v3798_v24  ;;  %3575 = vmatprep.mubr.msk.f32.mxu1 %vm241_vm2, %v2079_v30 }
0x138f   :  { %3576 = vmatmul.mubr.msk.f32.vlgmr.msra.gmra.mrb[18].mxu1 %vm241_vm2, %v2081_v31 }
0x1425   :  { %v4596_v36 = vpop.f32.mrb[14].mxu1 }
0x1426   :  { %v4598_v35 = vpop.f32.mrb[15].mxu1 }
0x145a   :  { %v4600_v37 = vpop.f32.mrb[16].mxu1 }
0x145b   :  { %v4602_v34 = vpop.f32.mrb[17].mxu1 }
0x1462   :  { %v3577_v22 = vpop.f32.mrb[18].mxu1 }
0x1463   :  { %v2166_v9 = vadd.f32 %v4049_v43, %v3577_v22  ;;  %v2160_v45 = vpop.f32.mrb[19].mxu1 }
0x1464   :  { %v2161_v48 = vadd.f32 %v4050_v46, %v2160_v45 }
0x1465   :  { %v2172_v49 = vsel %vm39_vm0, %v2166_v9, -inf }
0x1466   :  { %2173 = vmax.xlane.f32.xlu0 %v2172_v49  ;;  %v2169_v16 = vsel %vm39_vm0, %v2161_v48, -inf }
0x1467   :  { %2170 = vmax.xlane.f32.xlu1 %v2169_v16 }
0x14f3   :  { %v2174_v53 = vpop.xlane.xlu0 %2173 }
0x14f4   :  { %v2176_v54 = vsub.f32 %v2166_v9, %v2174_v53  ;;  %v2171_v56 = vpop.xlane.xlu1 %2170 }
0x14f5   :  { %v2175_v58 = vsub.f32 %v2161_v48, %v2171_v56 }
0x14f6   :  { %v2179_v60 = vmul.f32 1.442695, %v2176_v54 }
0x14f7   :  { %v2177_v61 = vmul.f32 1.442695, %v2175_v58 }
0x14f8   :  { %4025 = vpow2.f32 %v2179_v60 }
0x14f9   :  { %4027 = vpow2.f32 %v2177_v61 }
0x1502   :  { %v4026_v38 = vpop.eup %4025 }
0x1503   :  { %v4028_v62 = vpop.eup %4027  ;;  %v2184_v63 = vsel %vm39_vm0, %v4026_v38, 0.0 }
0x1504   :  { %2185 = vadd.xlane.f32.xlu1 %v2184_v63  ;;  %v2181_v0 = vsel %vm39_vm0, %v4028_v62, 0.0 }
0x1505   :  { %2182 = vadd.xlane.f32.xlu0 %v2181_v0 }
0x1515   :  { %3960 = vrot.lane.b32.xlu1 %v4530_v52, %s4058_s21  ;;  %s4065_s21 = smov 32  }
0x1519   :  { %2278 = vrot.lane.b32.xlu1 %v4524_v15, %s4059_s22 }
0x151b   :  { %3955 = vrot.lane.b32.xlu0 %v4530_v52, %s4060_s23 }
0x151f   :  { %2280 = vrot.lane.b32.xlu0 %v4522_v50, %s4059_s22 }
0x1591   :  { %v2186_v2 = vpop.xlane.xlu1 %2185 }
0x1592   :  { %4029 = vrcp.f32 %v2186_v2  ;;  %v2183_v6 = vpop.xlane.xlu0 %2182 }
0x1593   :  { %4031 = vrcp.f32 %v2183_v6 }
0x1595   :  { %v3961_v7 = vpop.permute.xlu1 %3960 }
0x1596   :  { %v3956_v10 = vpop.permute.xlu0 %3955  ;;  %v3963_v11 = vunpack.i.h.bf16 %v3961_v7  ;;  %v3962_v17 = vunpack.i.l.bf16 %v3961_v7 }
0x1597   :  { %v3958_v41 = vunpack.i.h.bf16 %v3956_v10  ;;  %v3957_v20 = vunpack.i.l.bf16 %v3956_v10 }
0x1598   :  { %v3808_v40 = vpack.c.bf16 %v3963_v11, %v3962_v17 }
0x1599   :  { %v3804_v24 = vpack.c.bf16 %v3958_v41, %v3957_v20  ;;  %v2279_v30 = vpop.permute.xlu1 %2278 }
0x159a   :  { %v2281_v31 = vpop.permute.xlu0 %2280 }
0x159b   :  { %3805 = vmatprep.subr.bf16.mxu0 %v3804_v24 }
0x159c   :  { %v4030_v15 = vpop.eup %4029  ;;  %3807 = vmatpush3.bf16.msra.mxu0 %v3804_v24 }
0x159d   :  { %v4032_v25 = vpop.eup %4031  ;;  %3810 = vmatprep.subr.msk.bf16.mxu0 %vm4154_vm3, %v3808_v40  ;;  %v4626_v27 = vmul.f32 %v4030_v15, %v4026_v38 }
0x159e   :  { %v4624_v50 = vmul.f32 %v4032_v25, %v4028_v62 }
0x15a0   :  { %3582 = vmatprep.mubr.msk.f32.mxu0 %vm39_vm0, %v4624_v50 }
0x15a1   :  { %3583 = vmatmul.mubr.msk.f32.vlgmr.msra.gmra.mrb[20].mxu0 %vm39_vm0, %v4626_v27 }
0x15a2   :  { %3589 = vmatprep.mubr.msk.f32.mxu0 %vm241_vm2, %v2279_v30 }
0x15a5   :  { %3813 = vmatpush3.bf16.xpose.msk.msra.mxu0 %vm4154_vm3, %v3808_v40 }
0x15ac   :  { %3590 = vmatmul.mubr.msk.f32.vlgmr.msra.gmra.mrb[22].mxu0 %vm241_vm2, %v2281_v31 }
0x1674   :  { %v4636_v22 = vpop.f32.mrb[20].mxu0 }
0x1675   :  { %v4638_v9 = vpop.f32.mrb[21].mxu0 }
0x167f   :  { %v3591_v45 = vpop.f32.mrb[22].mxu0 }
0x1680   :  { %v2366_v48 = vadd.f32 %v4049_v43, %v3591_v45  ;;  %v2360_v49 = vpop.f32.mrb[23].mxu0 }
0x1681   :  { %v2361_v16 = vadd.f32 %v4050_v46, %v2360_v49 }
0x1682   :  { %v2372_v53 = vsel %vm39_vm0, %v2366_v48, -inf }
0x1683   :  { %2373 = vmax.xlane.f32.xlu0 %v2372_v53  ;;  %v2369_v54 = vsel %vm39_vm0, %v2361_v16, -inf }
0x1684   :  { %2370 = vmax.xlane.f32.xlu1 %v2369_v54 }
0x1710   :  { %v2374_v56 = vpop.xlane.xlu0 %2373 }
0x1711   :  { %v2376_v26 = vsub.f32 %v2366_v48, %v2374_v56  ;;  %v2371_v58 = vpop.xlane.xlu1 %2370 }
0x1712   :  { %v2375_v60 = vsub.f32 %v2361_v16, %v2371_v58 }
0x1713   :  { %v2379_v61 = vmul.f32 1.442695, %v2376_v26 }
0x1714   :  { %v2377_v38 = vmul.f32 1.442695, %v2375_v60 }
0x1715   :  { %4033 = vpow2.f32 %v2379_v61 }
0x1716   :  { %4035 = vpow2.f32 %v2377_v38 }
0x171f   :  { %v4034_v62 = vpop.eup %4033 }
0x1720   :  { %v4036_v63 = vpop.eup %4035  ;;  %v2384_v43 = vsel %vm39_vm0, %v4034_v62, 0.0 }
0x1721   :  { %2385 = vadd.xlane.f32.xlu1 %v2384_v43  ;;  %v2381_v46 = vsel %vm39_vm0, %v4036_v63, 0.0 }
0x1722   :  { %2382 = vadd.xlane.f32.xlu0 %v2381_v46 }
0x1732   :  { %2486 = vrot.lane.b32.xlu1 %v4598_v35, %s4061_s24 }
0x1736   :  { %2488 = vrot.lane.b32.xlu1 %v4596_v36, %s4061_s24 }
0x1738   :  { %3965 = vrot.lane.b32.xlu0 %v4530_v52, %s4062_s25 }
0x173a   :  { %2512 = vrot.lane.b32.xlu1 %v4596_v36, %s4063_s26 }
0x173c   :  { %2510 = vrot.lane.b32.xlu0 %v4598_v35, %s4063_s26 }
0x173e   :  { %2536 = vrot.lane.b32.xlu1 %v4596_v36, %s4064_s27 }
0x1740   :  { %2534 = vrot.lane.b32.xlu0 %v4598_v35, %s4064_s27 }
0x1742   :  { %2492 = vrot.lane.b32.xlu1 %v4600_v37, %s4061_s24 }
0x1744   :  { %2490 = vrot.lane.b32.xlu0 %v4602_v34, %s4061_s24 }
0x1746   :  { %2516 = vrot.lane.b32.xlu1 %v4600_v37, %s4063_s26 }
0x1748   :  { %2514 = vrot.lane.b32.xlu0 %v4602_v34, %s4063_s26 }
0x174a   :  { %2540 = vrot.lane.b32.xlu1 %v4600_v37, %s4064_s27 }
0x174c   :  { %2538 = vrot.lane.b32.xlu0 %v4602_v34, %s4064_s27 }
0x174e   :  { %2496 = vrot.lane.b32.xlu1 %v4636_v22, %s4061_s24 }
0x1750   :  { %2494 = vrot.lane.b32.xlu0 %v4638_v9, %s4061_s24 }
0x1752   :  { %2520 = vrot.lane.b32.xlu1 %v4636_v22, %s4063_s26 }
0x1754   :  { %2518 = vrot.lane.b32.xlu0 %v4638_v9, %s4063_s26 }
0x1756   :  { %2544 = vrot.lane.b32.xlu1 %v4636_v22, %s4064_s27 }
0x1758   :  { %2542 = vrot.lane.b32.xlu0 %v4638_v9, %s4064_s27 }
0x17ae   :  { %v2386_v52 = vpop.xlane.xlu1 %2385 }
0x17af   :  { %4037 = vrcp.f32 %v2386_v52  ;;  %v2383_v0 = vpop.xlane.xlu0 %2382 }
0x17b0   :  { %4039 = vrcp.f32 %v2383_v0 }
0x17b2   :  { %v2487_v2 = vpop.permute.xlu1 %2486 }
0x17b3   :  { %v3966_v6 = vpop.permute.xlu0 %3965  ;;  %v2558_v15 = vsel %vm241_vm2, %v4598_v35, %v2487_v2 }
0x17b4   :  { %v3968_v7 = vunpack.i.h.bf16 %v3966_v6  ;;  %v3967_v10 = vunpack.i.l.bf16 %v3966_v6 }
0x17b6   :  { %v3814_v11 = vpack.c.bf16 %v3968_v7, %v3967_v10  ;;  %v2489_v17 = vpop.permute.xlu1 %2488 }
0x17b7   :  { %v2511_v41 = vpop.permute.xlu0 %2510  ;;  %v2559_v48 = vsel %vm241_vm2, %v4596_v36, %v2489_v17 }
0x17b8   :  { %3815 = vmatprep.subr.bf16.mxu1 %v3814_v11  ;;  %v2566_v45 = vsel %vm39_vm0, %v2558_v15, %v2511_v41 }
0x17b9   :  { %v4038_v20 = vpop.eup %4037  ;;  %3817 = vmatpush3.bf16.msra.mxu1 %v3814_v11 }
0x17ba   :  { %v4040_v24 = vpop.eup %4039  ;;  %v2513_v40 = vpop.permute.xlu1 %2512  ;;  %v4686_v31 = vmul.f32 %v4038_v20, %v4034_v62 }
0x17bb   :  { %v2535_v25 = vpop.permute.xlu0 %2534  ;;  %v4684_v30 = vmul.f32 %v4040_v24, %v4036_v63  ;;  %v2567_v16 = vsel %vm39_vm0, %v2559_v48, %v2513_v40 }
0x17bc   :  { %v2574_v49 = vsel %vm1130_vm4, %v2566_v45, %v2535_v25 }
0x17bd   :  { %3596 = vmatprep.mubr.msk.f32.mxu1 %vm39_vm0, %v4684_v30  ;;  %v2582_v56 = vmul.f32 %v2574_v49, %v4320_v59  ;;  %v1574_v49 = vld [vmem:[%s4896_s1 + $0x178] sm:$0xff] }
0x17be   :  { %3597 = vmatmul.mubr.msk.f32.vlgmr.msra.gmra.mrb[20].mxu1 %vm39_vm0, %v4686_v31  ;;  %v2537_v35 = vpop.permute.xlu1 %2536 }
0x17bf   :  { %v2575_v53 = vsel %vm1130_vm4, %v2567_v16, %v2537_v35  ;;  %v2491_v54 = vpop.permute.xlu0 %2490  ;;  %3615 = vmatprep.mubr.msk.f32.mxu1 %vm1147_vm5, %v4381_v51 }
0x17c0   :  { %v2583_v36 = vmul.f32 %v2575_v53, %v4328_v39  ;;  %v2560_v38 = vsel %vm241_vm2, %v4602_v34, %v2491_v54 }
0x17c2   :  { %v2493_v26 = vpop.permute.xlu1 %2492  ;;  %v3818_v58 = vpack.c.bf16 %v2583_v36, %v2582_v56 }
0x17c3   :  { %v2515_v60 = vpop.permute.xlu0 %2514  ;;  %v2561_v43 = vsel %vm241_vm2, %v4600_v37, %v2493_v26 }
0x17c4   :  { %3819 = vmatprep.subr.bf16.mxu1 %v3818_v58  ;;  %v2568_v63 = vsel %vm39_vm0, %v2560_v38, %v2515_v60 }
0x17c5   :  { %3821 = vmatpush3.bf16.msra.mxu1 %v3818_v58 }
0x17c6   :  { %v2517_v61 = vpop.permute.xlu1 %2516 }
0x17c7   :  { %v2539_v62 = vpop.permute.xlu0 %2538  ;;  %v2569_v59 = vsel %vm39_vm0, %v2561_v43, %v2517_v61 }
0x17c8   :  { %v2576_v51 = vsel %vm1130_vm4, %v2568_v63, %v2539_v62 }
0x17c9   :  { %v2584_v0 = vmul.f32 %v2576_v51, %v4344_v12 }
0x17ca   :  { %v2541_v39 = vpop.permute.xlu1 %2540 }
0x17cb   :  { %v2577_v46 = vsel %vm1130_vm4, %v2569_v59, %v2541_v39  ;;  %v2495_v52 = vpop.permute.xlu0 %2494 }
0x17cc   :  { %v2585_v2 = vmul.f32 %v2577_v46, %v4350_v18  ;;  %v2562_v37 = vsel %vm241_vm2, %v4638_v9, %v2495_v52 }
0x17ce   :  { %v2497_v6 = vpop.permute.xlu1 %2496  ;;  %v3822_v34 = vpack.c.bf16 %v2585_v2, %v2584_v0 }
0x17cf   :  { %v2519_v7 = vpop.permute.xlu0 %2518  ;;  %v2563_v41 = vsel %vm241_vm2, %v4636_v22, %v2497_v6  ;;  %v1571_v22 = vld [vmem:[%s4896_s1 + $0x160] sm:$0xff] }
0x17d0   :  { %3823 = vmatprep.subr.bf16.mxu1 %v3822_v34  ;;  %v2570_v17 = vsel %vm39_vm0, %v2562_v37, %v2519_v7 }
0x17d1   :  { %3825 = vmatpush3.bf16.msra.mxu1 %v3822_v34 }
0x17d2   :  { %v2521_v10 = vpop.permute.xlu1 %2520 }
0x17d3   :  { %v2543_v11 = vpop.permute.xlu0 %2542  ;;  %v2571_v12 = vsel %vm39_vm0, %v2563_v41, %v2521_v10 }
0x17d4   :  { %v2578_v20 = vsel %vm1130_vm4, %v2570_v17, %v2543_v11 }
0x17d5   :  { %v2586_v40 = vmul.f32 %v2578_v20, %v4364_v42  ;;  %v1572_v42 = vld [vmem:[%s4896_s1 + $0x168] sm:$0xff] }
0x17d6   :  { %v2545_v18 = vpop.permute.xlu1 %2544  ;;  %v3834_v48 = vpack.c.bf16 %v1572_v42, %v1571_v22  ;;  %v1579_v22 = vld [vmem:[%s4896_s1 + $0x1a0] sm:$0xff]  ;;  %v1580_v42 = vld [vmem:[%s4896_s1 + $0x1a8] sm:$0xff] }
0x17d7   :  { %v2579_v24 = vsel %vm1130_vm4, %v2571_v12, %v2545_v18 }
0x17d8   :  { %v2587_v15 = vmul.f32 %v2579_v24, %v4370_v44  ;;  %v1573_v44 = vld [vmem:[%s4896_s1 + $0x170] sm:$0xff]  ;;  %3835 = vmatprep.subr.bf16.mxu0 %v3834_v48 }
0x17d9   :  { %v3838_v16 = vpack.c.bf16 %v1574_v49, %v1573_v44  ;;  %3837 = vmatpush3.bf16.msra.mxu0 %v3834_v48  ;;  %v1581_v44 = vld [vmem:[%s4896_s1 + $0x1b0] sm:$0xff]  ;;  %v3850_v48 = vpack.c.bf16 %v1580_v42, %v1579_v22  ;;  %v1582_v49 = vld [vmem:[%s4896_s1 + $0x1b8] sm:$0xff] }
0x17da   :  { %v3826_v25 = vpack.c.bf16 %v2587_v15, %v2586_v40  ;;  %v1576_v40 = vld [vmem:[%s4896_s1 + $0x188] sm:$0xff] }
0x17db   :  { %3839 = vmatprep.subr.bf16.mxu0 %v3838_v16 }
0x17dc   :  { %3827 = vmatprep.subr.bf16.mxu1 %v3826_v25 }
0x17dd   :  { %3829 = vmatpush3.bf16.msra.mxu1 %v3826_v25  ;;  %3841 = vmatpush3.bf16.msra.mxu0 %v3838_v16  ;;  %v1577_v25 = vld [vmem:[%s4896_s1 + $0x190] sm:$0xff]  ;;  %v3854_v16 = vpack.c.bf16 %v1582_v49, %v1581_v44 }
0x1891   :  { %v3598_v9 = vpop.f32.mrb[20].mxu1 }
0x1892   :  { %2500 = vrot.lane.b32.xlu1 %v3598_v9, %s4061_s24  ;;  %v2469_v45 = vpop.f32.mrb[21].mxu1 }
0x1893   :  { %2498 = vrot.lane.b32.xlu0 %v2469_v45, %s4061_s24 }
0x1896   :  { %2524 = vrot.lane.b32.xlu1 %v3598_v9, %s4063_s26 }
0x1897   :  { %2522 = vrot.lane.b32.xlu0 %v2469_v45, %s4063_s26 }
0x189a   :  { %2548 = vrot.lane.b32.xlu1 %v3598_v9, %s4064_s27 }
0x189b   :  { %2546 = vrot.lane.b32.xlu0 %v2469_v45, %s4064_s27 }
0x1904   :  { %v2501_v35 = vpop.permute.xlu1 %2500 }
0x1905   :  { %v2499_v53 = vpop.permute.xlu0 %2498  ;;  %v2565_v36 = vsel %vm241_vm2, %v3598_v9, %v2501_v35  ;;  %v1578_v9 = vld [vmem:[%s4896_s1 + $0x198] sm:$0xff]  ;;  %v1583_v35 = vld [vmem:[%s4896_s1 + $0x1c0] sm:$0xff] }
0x1906   :  { %v2564_v26 = vsel %vm241_vm2, %v2469_v45, %v2499_v53  ;;  %v3846_v45 = vpack.c.bf16 %v1578_v9, %v1577_v25  ;;  %v1584_v53 = vld [vmem:[%s4896_s1 + $0x1c8] sm:$0xff] }
0x1908   :  { %v2525_v54 = vpop.permute.xlu1 %2524 }
0x1909   :  { %v2523_v56 = vpop.permute.xlu0 %2522  ;;  %v2573_v58 = vsel %vm39_vm0, %v2565_v36, %v2525_v54  ;;  %v3858_v54 = vpack.c.bf16 %v1584_v53, %v1583_v35  ;;  %v32_v35 = vld [vmem:[%s4896_s1 + $0x80] sm:$0xff]  ;;  %v33_v53 = vld [vmem:[%s4896_s1 + $0x88] sm:$0xff] }
0x190a   :  { %v2572_v61 = vsel %vm39_vm0, %v2564_v26, %v2523_v56 }
0x190c   :  { %v2549_v60 = vpop.permute.xlu1 %2548 }
0x190d   :  { %v2581_v38 = vsel %vm1130_vm4, %v2573_v58, %v2549_v60  ;;  %v2547_v62 = vpop.permute.xlu0 %2546 }
0x190e   :  { %v2589_v63 = vmul.f32 %v2581_v38, %v4405_v1  ;;  %v2580_v43 = vsel %vm1130_vm4, %v2572_v61, %v2547_v62  ;;  %v3232_v1 = vld [vmem:[%s4898_s2 + $0x9] ss:$0 sm:$0xff]  ;;  %v3235_v62 = vld [vmem:[%s4898_s2 + $0xc] ss:$0 sm:$0xff] }
0x190f   :  { %v2588_v51 = vmul.f32 %v2580_v43, %v4412_v4  ;;  %v3236_v43 = vld [vmem:[%s4898_s2 + $0xd] ss:$0 sm:$0xff] }
0x1911   :  { %v3830_v59 = vpack.c.bf16 %v2589_v63, %v2588_v51 }
0x1913   :  { %3831 = vmatprep.subr.bf16.mxu1 %v3830_v59 }
0x1914   :  { %3833 = vmatpush3.bf16.msra.mxu1 %v3830_v59 }
0x1915   :  { %3851 = vmatprep.subr.bf16.mxu1 %v3850_v48 }
0x1917   :  { %3616 = vmatmul.mubr.msk.f32.vlgmr.msra.gmra.mrb[22].mxu1 %vm1147_vm5, %v4422_v23 }
0x1918   :  { %3853 = vmatpush3.bf16.msra.mxu1 %v3850_v48 }
0x1919   :  { %3855 = vmatprep.subr.bf16.mxu1 %v3854_v16 }
0x191c   :  { %3857 = vmatpush3.bf16.msra.mxu1 %v3854_v16 }
0x191d   :  { %3859 = vmatprep.subr.bf16.mxu1 %v3858_v54 }
0x1920   :  { %3861 = vmatpush3.bf16.msra.mxu1 %v3858_v54 }
0x19ea   :  { %v3617_v39 = vpop.f32.mrb[22].mxu1 }
0x19eb   :  { %v2656_v46 = vpop.f32.mrb[23].mxu1 }
0x19ec   :  { %3626 = vmatprep.mubr.msk.f32.mxu0 %vm153_vm1, %v2656_v46 }
0x19ed   :  { %3627 = vmatmul.mubr.msk.f32.vlgmr.msra.gmra.mrb[24].mxu0 %vm153_vm1, %v3617_v39 }
0x1ac0   :  { %v3628_v52 = vpop.f32.mrb[24].mxu0 }
0x1ac1   :  { %v2747_v0 = vadd.f32 %v3628_v52, %v3232_v1  ;;  %v2741_v2 = vpop.f32.mrb[25].mxu0 }
0x1ac2   :  { %v2742_v4 = vadd.f32 %v3232_v1, %v2741_v2  ;;  %v1586_v2 = vld [vmem:[%s4896_s1 + $0x1d8] sm:$0xff] }
0x1ac3   :  { %v2751_v6 = vadd.f32 %v2747_v0, %v4513_v8  ;;  %v1585_v0 = vld [vmem:[%s4896_s1 + $0x1d0] sm:$0xff] }
0x1ac4   :  { %v2750_v34 = vadd.f32 %v2742_v4, %v4511_v47  ;;  %v1575_v47 = vld [vmem:[%s4896_s1 + $0x180] sm:$0xff]  ;;  %v3862_v4 = vpack.c.bf16 %v1586_v2, %v1585_v0 }
0x1ac5   :  { %v2755_v23 = vsel %vm153_vm1, %v2751_v6, 0.0  ;;  %v3842_v15 = vpack.c.bf16 %v1576_v40, %v1575_v47 }
0x1ac6   :  { %2756 = vadd.xlane.f32.xlu1 %v2755_v23  ;;  %v2752_v7 = vsel %vm153_vm1, %v2750_v34, 0.0  ;;  %3863 = vmatprep.subr.bf16.mxu1 %v3862_v4 }
0x1ac7   :  { %2753 = vadd.xlane.f32.xlu0 %v2752_v7  ;;  %3843 = vmatprep.subr.bf16.mxu0 %v3842_v15 }
0x1ac8   :  { %3845 = vmatpush3.bf16.msra.mxu0 %v3842_v15  ;;  %3865 = vmatpush3.bf16.msra.mxu1 %v3862_v4 }
0x1ac9   :  { %3847 = vmatprep.subr.bf16.mxu0 %v3846_v45 }
0x1acc   :  { %3849 = vmatpush3.bf16.msra.mxu0 %v3846_v45 }
0x1b53   :  { %v2757_v10 = vpop.xlane.xlu1 %2756 }
0x1b54   :  { %v2759_v37 = vmul.f32 0.03125, %v2757_v10  ;;  %v2754_v11 = vpop.xlane.xlu0 %2753 }
0x1b55   :  { %v2758_v17 = vmul.f32 0.03125, %v2754_v11 }
0x1b56   :  { %v2761_v41 = vsub.f32 %v2751_v6, %v2759_v37  ;;  %v3237_v6 = vld [vmem:[%s4898_s2 + $0xa] ss:$0 sm:$0xff] }
0x1b57   :  { %v2760_v20 = vsub.f32 %v2750_v34, %v2758_v17  ;;  %v3240_v17 = vld [vmem:[%s4898_s2 + $0xb] ss:$0 sm:$0xff] }
0x1b58   :  { %v2763_v24 = vmul.f32 %v2761_v41, %v2761_v41 }
0x1b59   :  { %v2762_v12 = vmul.f32 %v2760_v20, %v2760_v20 }
0x1b5a   :  { %v2767_v8 = vsel %vm153_vm1, %v2763_v24, 0.0 }
0x1b5b   :  { %v2764_v18 = vsel %vm153_vm1, %v2762_v12, 0.0 }
0x1b5c   :  { %2765 = vadd.xlane.f32.xlu0 %v2764_v18 }
0x1b60   :  { %2768 = vadd.xlane.f32.xlu0 %v2767_v8 }
0x1be9   :  { %v2766_v56 = vpop.xlane.xlu0 %2765 }
0x1bea   :  { %v2770_v36 = vmul.f32 0.03125, %v2766_v56 }
0x1bec   :  { %v2772_v26 = vadd.f32 1e-09, %v2770_v36 }
0x1bed   :  { %v2769_v58 = vpop.xlane.xlu0 %2768 }
0x1bee   :  { %4041 = vrsqrt.f32 %v2772_v26  ;;  %v2771_v60 = vmul.f32 0.03125, %v2769_v58 }
0x1bf0   :  { %v2773_v61 = vadd.f32 1e-09, %v2771_v60 }
0x1bf2   :  { %4043 = vrsqrt.f32 %v2773_v61 }
0x1bf8   :  { %v4042_v38 = vpop.eup %4041 }
0x1bf9   :  { %v2776_v63 = vmul.f32 %v4042_v38, %v2760_v20 }
0x1bfb   :  { %v2782_v51 = vmul.f32 %v3235_v62, %v2776_v63 }
0x1bfc   :  { %v4044_v59 = vpop.eup %4043 }
0x1bfd   :  { %v2777_v39 = vmul.f32 %v4044_v59, %v2761_v41  ;;  %v2788_v46 = vadd.f32 %v3236_v43, %v2782_v51  ;;  %v3244_v51 = vld [vmem:[%s4898_s2 + $0xf] ss:$0 sm:$0xff] }
0x1bff   :  { %v2783_v1 = vmul.f32 %v3235_v62, %v2777_v39  ;;  %3637 = vmatprep.mubr.msk.f32.mxu0 %vm153_vm1, %v2788_v46 }
0x1c01   :  { %v2789_v52 = vadd.f32 %v3236_v43, %v2783_v1 }
0x1c03   :  { %3638 = vmatmul.mubr.msk.f32.vlgmr.msra.gmra.mrb[26].mxu0 %vm153_vm1, %v2789_v52 }
0x1cd6   :  { %v3639_v34 = vpop.f32.mrb[26].mxu0 }
0x1cd7   :  { %v2872_v23 = vadd.f32 %v3639_v34, %v3237_v6  ;;  %v2866_v7 = vpop.f32.mrb[27].mxu0 }
0x1cd8   :  { %v2867_v10 = vadd.f32 %v3237_v6, %v2866_v7 }
0x1cd9   :  { %v2876_v11 = vmax.f32 %v2872_v23, 0.0 }
0x1cda   :  { %v2875_v37 = vmax.f32 %v2867_v10, 0.0 }
0x1cdc   :  { %3656 = vmatprep.mubr.msk.f32.mxu1 %vm1147_vm5, %v2875_v37 }
0x1cdd   :  { %3657 = vmatmul.mubr.msk.f32.vlgmr.msra.gmra.mrb[24].mxu1 %vm1147_vm5, %v2876_v11 }
0x1db0   :  { %v3658_v41 = vpop.f32.mrb[24].mxu1 }
0x1db1   :  { %v2959_v20 = vadd.f32 %v3658_v41, %v3240_v17  ;;  %v2953_v12 = vpop.f32.mrb[25].mxu1 }
0x1db2   :  { %v2954_v18 = vadd.f32 %v3240_v17, %v2953_v12 }
0x1db3   :  { %v2963_v24 = vadd.f32 %v2959_v20, %v2789_v52 }
0x1db4   :  { %v2962_v8 = vadd.f32 %v2954_v18, %v2788_v46 }
0x1db5   :  { %v2967_v47 = vsel %vm153_vm1, %v2963_v24, 0.0 }
0x1db6   :  { %2968 = vadd.xlane.f32.xlu0 %v2967_v47  ;;  %v2964_v40 = vsel %vm153_vm1, %v2962_v8, 0.0 }
0x1db7   :  { %2965 = vadd.xlane.f32.xlu1 %v2964_v40 }
0x1e43   :  { %v2969_v15 = vpop.xlane.xlu0 %2968 }
0x1e44   :  { %v2971_v25 = vmul.f32 0.03125, %v2969_v15  ;;  %v2966_v9 = vpop.xlane.xlu1 %2965 }
0x1e45   :  { %v2970_v45 = vmul.f32 0.03125, %v2966_v9 }
0x1e46   :  { %v2973_v22 = vsub.f32 %v2963_v24, %v2971_v25 }
0x1e47   :  { %v2972_v42 = vsub.f32 %v2962_v8, %v2970_v45 }
0x1e48   :  { %v2975_v44 = vmul.f32 %v2973_v22, %v2973_v22 }
0x1e49   :  { %v2974_v48 = vmul.f32 %v2972_v42, %v2972_v42 }
0x1e4a   :  { %v2979_v49 = vsel %vm153_vm1, %v2975_v44, 0.0 }
0x1e4b   :  { %2980 = vadd.xlane.f32.xlu0 %v2979_v49  ;;  %v2976_v16 = vsel %vm153_vm1, %v2974_v48, 0.0 }
0x1e4c   :  { %2977 = vadd.xlane.f32.xlu1 %v2976_v16 }
0x1e5d   :  { %3089 = vrot.lane.b32.xlu1 %v4212_v32, %s4063_s26  ;;  %v3866_v32 = vpack.c.bf16 %v33_v53, %v32_v35 }
0x1e5f   :  { %3867 = vmatprep.subr.bf16.mxu0 %v3866_v32 }
0x1e60   :  { %3869 = vmatpush3.bf16.msra.mxu0 %v3866_v32 }
0x1e61   :  { %3091 = vrot.lane.b32.xlu0 %v4214_v33, %s4063_s26  ;;  %3095 = vrot.lane.b32.xlu1 %v4248_v19, %s4065_s21  ;;  %v34_v33 = vld [vmem:[%s4896_s1 + $0x90] sm:$0xff]  ;;  %v35_v19 = vld [vmem:[%s4896_s1 + $0x98] sm:$0xff] }
0x1e65   :  { %3101 = vrot.lane.b32.xlu0 %v4310_v55, %s4060_s23  ;;  %3097 = vrot.lane.b32.xlu1 %v4250_v5, %s4065_s21  ;;  %v3870_v5 = vpack.c.bf16 %v35_v19, %v34_v33 }
0x1e67   :  { %3871 = vmatprep.subr.bf16.mxu0 %v3870_v5 }
0x1e68   :  { %3873 = vmatpush3.bf16.msra.mxu0 %v3870_v5 }
0x1e69   :  { %3107 = vrot.lane.b32.xlu0 %v4574_v3, %s4054_s17  ;;  %3103 = vrot.lane.b32.xlu1 %v4313_v57, %s4060_s23 }
0x1e6d   :  { %3113 = vrot.lane.b32.xlu0 %v4584_v28, %s4055_s18  ;;  %3109 = vrot.lane.b32.xlu1 %v4576_v21, %s4054_s17 }
0x1e71   :  { %3119 = vrot.lane.b32.xlu0 %v4624_v50, %s4052_s11  ;;  %3115 = vrot.lane.b32.xlu1 %v4586_v29, %s4055_s18 }
0x1e75   :  { %3125 = vrot.lane.b32.xlu0 %v4684_v30, %s4057_s20  ;;  %3121 = vrot.lane.b32.xlu1 %v4626_v27, %s4052_s11 }
0x1e79   :  { %3127 = vrot.lane.b32.xlu1 %v4686_v31, %s4057_s20  ;;  %v3243_v31 = vld [vmem:[%s4898_s2 + $0xe] ss:$0 sm:$0xff] }
0x1ed8   :  { %v2981_v55 = vpop.xlane.xlu0 %2980 }
0x1ed9   :  { %v2983_v57 = vmul.f32 0.03125, %v2981_v55  ;;  %v2978_v3 = vpop.xlane.xlu1 %2977 }
0x1eda   :  { %v2982_v21 = vmul.f32 0.03125, %v2978_v3 }
0x1edb   :  { %v2985_v28 = vadd.f32 1e-09, %v2983_v57 }
0x1edc   :  { %v2984_v54 = vadd.f32 1e-09, %v2982_v21  ;;  %v3092_v56 = vpop.permute.xlu0 %3091 }
0x1edd   :  { %4045 = vrsqrt.f32 %v2985_v28  ;;  %v3090_v50 = vpop.permute.xlu1 %3089  ;;  %v3132_v10 = vsel %vm39_vm0, %v4204_v14, %v3092_v56  ;;  %v3245_v14 = vld [vmem:[%s4898_s2 + $0x10] ss:$0 sm:$0xff] }
0x1ede   :  { %4047 = vrsqrt.f32 %v2984_v54  ;;  %v3131_v27 = vsel %vm39_vm0, %v4202_v13, %v3090_v50 }
0x1ee0   :  { %v3102_v29 = vpop.permute.xlu0 %3101 }
0x1ee1   :  { %v3096_v36 = vpop.permute.xlu1 %3095 }
0x1ee2   :  { %v3133_v38 = vsel %vm153_vm1, %v3131_v27, %v3096_v36 }
0x1ee3   :  { %v3136_v39 = vsel %vm3135_vm6, %v3133_v38, %v3102_v29 }
0x1ee4   :  { %v3108_v26 = vpop.permute.xlu0 %3107 }
0x1ee5   :  { %v3098_v30 = vpop.permute.xlu1 %3097  ;;  %v3138_v0 = vsel %vm1147_vm5, %v3136_v39, %v3108_v26 }
0x1ee6   :  { %v3134_v37 = vsel %vm153_vm1, %v3132_v10, %v3098_v30 }
0x1ee7   :  { %v4046_v58 = vpop.eup %4045 }
0x1ee8   :  { %v4048_v60 = vpop.eup %4047  ;;  %v2989_v61 = vmul.f32 %v4046_v58, %v2973_v22  ;;  %v3114_v62 = vpop.permute.xlu0 %3113 }
0x1ee9   :  { %v3104_v63 = vpop.permute.xlu1 %3103  ;;  %v2988_v43 = vmul.f32 %v4048_v60, %v2972_v42  ;;  %v3141_v4 = vsel %vm3140_vm7, %v3138_v0, %v3114_v62 }
0x1eea   :  { %v2995_v59 = vmul.f32 %v3243_v31, %v2989_v61  ;;  %v3137_v17 = vsel %vm3135_vm6, %v3134_v37, %v3104_v63 }
0x1eeb   :  { %v2994_v13 = vmul.f32 %v3243_v31, %v2988_v43 }
0x1eec   :  { %v3120_v46 = vpop.permute.xlu0 %3119  ;;  %v3001_v2 = vadd.f32 %v3244_v51, %v2995_v59 }
0x1eed   :  { %v3110_v1 = vpop.permute.xlu1 %3109  ;;  %v3000_v52 = vadd.f32 %v3244_v51, %v2994_v13  ;;  %v3144_v6 = vsel %vm3143_vm8, %v3141_v4, %v3120_v46 }
0x1eee   :  { %v3139_v41 = vsel %vm1147_vm5, %v3137_v17, %v3110_v1 }
0x1eef   :  { %3667 = vmatprep.mubr.msk.f32.mxu0 %vm153_vm1, %v3000_v52 }
0x1ef0   :  { %v3126_v34 = vpop.permute.xlu0 %3125  ;;  %3668 = vmatmul.mubr.msk.f32.vlgmr.msra.gmra.mrb[28].mxu0 %vm153_vm1, %v3001_v2 }
0x1ef1   :  { %v3147_v23 = vsel %vm3146_vm9, %v3144_v6, %v3126_v34  ;;  %v3116_v7 = vpop.permute.xlu1 %3115 }
0x1ef2   :  { %3149 = vst [vmem:[%s4899_s4] sm:$0xff] %v3147_v23  ;;  %v3142_v20 = vsel %vm3140_vm7, %v3139_v41, %v3116_v7 }
0x1ef5   :  { %v3122_v11 = vpop.permute.xlu1 %3121 }
0x1ef6   :  { %v3145_v12 = vsel %vm3143_vm8, %v3142_v20, %v3122_v11 }
0x1ef9   :  { %v3128_v18 = vpop.permute.xlu1 %3127 }
0x1efa   :  { %v3148_v24 = vsel %vm3146_vm9, %v3145_v12, %v3128_v18 }
0x1efb   :  { %3150 = vst [vmem:[%s4899_s4 + $0x8] sm:$0xff] %v3148_v24 }
0x1fc3   :  { %v3669_v8 = vpop.f32.mrb[28].mxu0 }
0x1fc4   :  { %v3084_v47 = vadd.f32 %v3669_v8, %v3245_v14  ;;  %v3078_v40 = vpop.f32.mrb[29].mxu0 }
0x1fc5   :  { %v3079_v15 = vadd.f32 %v3245_v14, %v3078_v40 }
0x1fc6   :  { %3088 = vst.msk [vmem:[%s4900_s3 + $0x8] sm:$0xff] %vm39_vm0, %v3084_v47 }
0x1fc7   :  { %3087 = vst.msk [vmem:[%s4900_s3] sm:$0xff] %vm39_vm0, %v3079_v15 }

</bundles_post_ra>
